<compile_context>
chip_gen: v6e
topology: v6e:2x2x1
jax: 0.10.0
libtpu: 0.0.40
codegen_flags: <defaults>
</compile_context>

<pallas_src>
import jax
import jax.numpy as jnp
from jax.experimental import pallas as pl
from jax.experimental.pallas import tpu as pltpu

EPS = 1e-5           # torch.nn.BatchNorm2d default eps
LEAKY_SLOPE = 0.2    # nn.LeakyReLU(0.2)
TM_MAX = 512
TK_MAX = 2048


def _round_up(v, m):
    return ((v + m - 1) // m) * m


def _vmem_limit_bytes():
    """~3/4 of physical VMEM: ~48 MiB on v7x (64 MiB), ~96 MiB on v5e/v6e (128 MiB)."""
    cap = 64 * 1024 * 1024
    try:
        info = pltpu.get_tpu_info()
        cap = int(getattr(info, "vmem_capacity_bytes", cap))
    except Exception:
        pass
    return max(32 * 1024 * 1024, min((cap * 3) // 4, 96 * 1024 * 1024))


VMEM_LIMIT = _vmem_limit_bytes()


# ------------------------------------------------------------------ kernels ---

def make_gemm_bias_act_kernel(act: bool):
    """Tiled im2col GEMM (bf16 x bf16 -> f32 acc) with bias [+ LeakyReLU] epilogue
    on the last K step.  Used for the non-BatchNorm layers."""
    def kernel(p_ref, w_ref, b_ref, o_ref, acc_ref):
        kk = pl.program_id(1)

        @pl.when(kk == 0)
        def _():
            acc_ref[...] = jnp.zeros_like(acc_ref)

        acc_ref[...] += jnp.dot(p_ref[...], w_ref[...],
                                preferred_element_type=jnp.float32)

        @pl.when(kk == pl.num_programs(1) - 1)
        def _():
            y = acc_ref[...] + b_ref[...]
            if act:
                y = jnp.where(y > 0, y, LEAKY_SLOPE * y)
            o_ref[...] = y.astype(o_ref.dtype)
    return kernel


def gemm_bn_stats_kernel(p_ref, w_ref, o_ref, stats_ref, acc_ref):
    """Tiled im2col GEMM; on the last K step the raw conv output is written (bf16)
    and this M-tile's per-channel sum / sum-of-squares are emitted (fused BN pass-2).
    Stats are per-M-tile partials, so the M grid axis stays 'parallel'-safe."""
    kk = pl.program_id(1)

    @pl.when(kk == 0)
    def _():
        acc_ref[...] = jnp.zeros_like(acc_ref)

    acc_ref[...] += jnp.dot(p_ref[...], w_ref[...],
                            preferred_element_type=jnp.float32)

    @pl.when(kk == pl.num_programs(1) - 1)
    def _():
        y = acc_ref[...]
        o_ref[...] = y.astype(o_ref.dtype)
        stats_ref[0] = jnp.concatenate(
            [jnp.sum(y, axis=0, keepdims=True),
             jnp.sum(y * y, axis=0, keepdims=True)], axis=0)


def bn_apply_kernel(y_ref, a_ref, o_ref):
    """y * scale + shift (train-mode BN folded to per-channel affine) + LeakyReLU."""
    y = y_ref[...].astype(jnp.float32)
    a = a_ref[...]
    y = y * a[0:1, :] + a[1:2, :]
    y = jnp.where(y > 0, y, LEAKY_SLOPE * y)
    o_ref[...] = y.astype(o_ref.dtype)


def make_bce_mean_kernel(target: float, count: int, tm: int):
    """Numerically-stable BCEWithLogits (mean) vs a constant target.  Padding lives
    entirely in the last M tile, so the validity mask only runs there."""
    inv = 1.0 / count

    def kernel(x_ref, o_ref):
        i = pl.program_id(0)
        last = pl.num_programs(0) - 1

        @pl.when(i == 0)
        def _():
            o_ref[...] = jnp.zeros_like(o_ref)

        x = x_ref[...]
        loss = jnp.maximum(x, 0.0) - x * target + jnp.log1p(jnp.exp(-jnp.abs(x)))

        @pl.when(i < last)
        def _():
            o_ref[...] += jnp.sum(loss, axis=(0, 1), keepdims=True)

        @pl.when(i == last)
        def _():
            row = jax.lax.broadcasted_iota(jnp.int32, x.shape, 0) + i * tm
            col = jax.lax.broadcasted_iota(jnp.int32, x.shape, 1)
            masked = jnp.where((row * 128 + col) < count, loss, 0.0)
            o_ref[...] = (o_ref[...] +
                          jnp.sum(masked, axis=(0, 1), keepdims=True)) * inv
    return kernel


def make_l1_mean_kernel(count: int):
    """Mean |a-b|.  Padded elements are zero in both inputs, so no mask is needed."""
    inv = 1.0 / count

    def kernel(a_ref, b_ref, o_ref):
        i = pl.program_id(0)

        @pl.when(i == 0)
        def _():
            o_ref[...] = jnp.zeros_like(o_ref)

        o_ref[...] += jnp.sum(jnp.abs(a_ref[...] - b_ref[...]),
                              axis=(0, 1), keepdims=True)

        @pl.when(i == pl.num_programs(0) - 1)
        def _():
            o_ref[...] = o_ref[...] * inv
    return kernel


# --------------------------------------------------------------- host glue ----

def im2col_nhwc(x, k, s, p):
    """x: (N, H, W, C) NHWC (bf16) -> patches (N*Ho*Wo, k*k*C), (kh, kw, Cin) order."""
    N, H, W, C = x.shape
    xp = jnp.pad(x, ((0, 0), (p, p), (p, p), (0, 0)))
    Ho = (H + 2 * p - k) // s + 1
    Wo = (W + 2 * p - k) // s + 1
    cols = []
    for i in range(k):
        for j in range(k):
            cols.append(xp[:, i:i + s * Ho:s, j:j + s * Wo:s, :])   # (N,Ho,Wo,C)
    pat = jnp.stack(cols, axis=3)                                   # (N,Ho,Wo,k*k,C)
    return pat.reshape(N * Ho * Wo, k * k * C), N, Ho, Wo


def _cpad(c):
    # multiples of 128 stay; >=64 stored un-padded (full-dim lane block); tiny heads -> 128
    if c % 128 == 0 or c >= 64:
        return c
    return 128


def _k_tiles(K):
    if K < 128:
        return K, K                       # single full-dim block (layer 0: K=48)
    K_pad = _round_up(K, 128)
    tk = K_pad
    if K_pad > TK_MAX:
        for cand in (TK_MAX, 1024, 512, 256, 128):
            if K_pad % cand == 0:
                tk = cand
                break
    return K_pad, tk


def _m_tiles(M):
    M8 = _round_up(M, 8)
    if M8 <= TM_MAX:
        return M8, M8
    return _round_up(M8, TM_MAX), TM_MAX


def conv_block(x_nhwc, layer):
    """One PatchDiscriminator block: Conv2d(k=4,p=1) [+ train-mode BN] [+ LeakyReLU].
    Input is bf16 NHWC, output is NHWC in layer['out_dtype']."""
    stride = layer['stride']
    Cout, Cpad = layer['Cout'], layer['Cpad']
    K_pad, tk = layer['K_pad'], layer['tk']

    patches, N, Ho, Wo = im2col_nhwc(x_nhwc, 4, stride, 1)
    M, K = patches.shape
    M_pad, tm = _m_tiles(M)
    nm, nk = M_pad // tm, K_pad // tk

    if (M_pad, K_pad) != (M, K):
        patches = jnp.pad(patches, ((0, M_pad - M), (0, K_pad - K)))

    gemm_params = pltpu.CompilerParams(
        dimension_semantics=("parallel", "arbitrary"),
        vmem_limit_bytes=VMEM_LIMIT)

    if layer['norm']:
        # ---- pass 1: GEMM + fused per-tile BN statistics (raw conv output) ----
        y, part = pl.pallas_call(
            gemm_bn_stats_kernel,
            out_shape=[jax.ShapeDtypeStruct((M_pad, Cpad), layer['out_dtype']),
                       jax.ShapeDtypeStruct((nm, 2, Cpad), jnp.float32)],
            grid=(nm, nk),
            in_specs=[pl.BlockSpec((tm, tk), lambda i, kk: (i, kk)),
                      pl.BlockSpec((tk, Cpad), lambda i, kk: (kk, 0))],
            out_specs=[pl.BlockSpec((tm, Cpad), lambda i, kk: (i, 0)),
                       pl.BlockSpec((1, 2, Cpad), lambda i, kk: (i, 0, 0))],
            scratch_shapes=[pltpu.VMEM((tm, Cpad), jnp.float32)],
            compiler_params=gemm_params,
        )(patches, layer['w_bf'])

        # Tiny per-channel reduction of the nm partials -> folded BN affine.
        # Zero-padded rows contribute 0 to the sums; 1/M uses the true M, so the
        # stats match PyTorch's per-batch (biased-variance) train-mode BatchNorm.
        s = jnp.sum(part, axis=0)                         # (2, Cpad), f32
        inv_m = 1.0 / M
        mean = s[0] * inv_m
        var = jnp.maximum(s[1] * inv_m - mean * mean, 0.0)
        scale = layer['gamma'] * jax.lax.rsqrt(var + EPS)
        shift = layer['beta'] - mean * scale
        affine = jnp.stack([scale, shift], axis=0)        # (2, Cpad)

        # ---- pass 2: normalize (folded affine) + LeakyReLU, elementwise over M ----
        y = pl.pallas_call(
            bn_apply_kernel,
            out_shape=jax.ShapeDtypeStruct((M_pad, Cpad), layer['out_dtype']),
            grid=(nm,),
            in_specs=[pl.BlockSpec((tm, Cpad), lambda i: (i, 0)),
                      pl.BlockSpec((2, Cpad), lambda i: (0, 0))],
            out_specs=pl.BlockSpec((tm, Cpad), lambda i: (i, 0)),
            compiler_params=pltpu.CompilerParams(
                dimension_semantics=("parallel",),
                vmem_limit_bytes=VMEM_LIMIT),
        )(y, affine)
    else:
        y = pl.pallas_call(
            make_gemm_bias_act_kernel(layer['act']),
            out_shape=jax.ShapeDtypeStruct((M_pad, Cpad), layer['out_dtype']),
            grid=(nm, nk),
            in_specs=[pl.BlockSpec((tm, tk), lambda i, kk: (i, kk)),
                      pl.BlockSpec((tk, Cpad), lambda i, kk: (kk, 0)),
                      pl.BlockSpec((1, Cpad), lambda i, kk: (0, 0))],
            out_specs=pl.BlockSpec((tm, Cpad), lambda i, kk: (i, 0)),
            scratch_shapes=[pltpu.VMEM((tm, Cpad), jnp.float32)],
            compiler_params=gemm_params,
        )(patches, layer['w_bf'], layer['b2d'])

    return y[:M, :Cout].reshape(N, Ho, Wo, Cout)          # stays NHWC


def _flat_tiles_2d(flat):
    """Flatten/pad a 1-D f32 vector into a lane-dense (rows_pad, 128) slab."""
    E = int(flat.shape[0])
    rows = -(-E // 128)
    rows8 = _round_up(rows, 8)
    if rows8 <= 512:
        rows_pad, tm = rows8, rows8
    else:
        rows_pad, tm = _round_up(rows, 512), 512
    x = jnp.zeros((rows_pad * 128,), jnp.float32).at[:E].set(flat.astype(jnp.float32))
    return x.reshape(rows_pad, 128), tm, rows_pad // tm, E


def bce_with_logits_mean(preds, target_is_real):
    t = 1.0 if target_is_real else 0.0
    x2d, tm, nm, E = _flat_tiles_2d(preds.reshape(-1))
    out = pl.pallas_call(
        make_bce_mean_kernel(t, E, tm),
        out_shape=jax.ShapeDtypeStruct((1, 1), jnp.float32),
        grid=(nm,),
        in_specs=[pl.BlockSpec((tm, 128), lambda i: (i, 0))],
        out_specs=pl.BlockSpec((1, 1), lambda i: (0, 0)),
        compiler_params=pltpu.CompilerParams(
            dimension_semantics=("arbitrary",),
            vmem_limit_bytes=VMEM_LIMIT),
    )(x2d)
    return out[0, 0]


def l1_mean(a, b):
    a2d, tm, nm, E = _flat_tiles_2d(a.reshape(-1))
    b2d, _, _, _ = _flat_tiles_2d(b.reshape(-1))
    out = pl.pallas_call(
        make_l1_mean_kernel(E),
        out_shape=jax.ShapeDtypeStruct((1, 1), jnp.float32),
        grid=(nm,),
        in_specs=[pl.BlockSpec((tm, 128), lambda i: (i, 0)),
                  pl.BlockSpec((tm, 128), lambda i: (i, 0))],
        out_specs=pl.BlockSpec((1, 1), lambda i: (0, 0)),
        compiler_params=pltpu.CompilerParams(
            dimension_semantics=("arbitrary",),
            vmem_limit_bytes=VMEM_LIMIT),
    )(a2d, b2d)
    return out[0, 0]


# ------------------------------------------------------ params / model glue ---

def xavier_normal_conv(key, shape, gain):
    # shape: (Cout, Cin, kh, kw); matches nn.init.xavier_normal_(gain=0.02)
    fan_in = shape[1] * shape[2] * shape[3]
    fan_out = shape[0] * shape[2] * shape[3]
    std = gain * (2.0 / (fan_in + fan_out)) ** 0.5
    return std * jax.random.normal(key, shape, dtype=jnp.float32)


def init_discriminator_params(key, input_c=3, num_filters=64, n_down=3, gain=0.02):
    # PatchDiscriminator(input_c=3, n_down=3, num_filters=64):
    #   Conv(3,64,s=2)+LReLU ; [Conv+BN+LReLU]*3 (strides 2,2,1) ; Conv(512,1,s=1)
    # Weight slabs / affine vectors are padded, transposed and cast ONCE here.
    cfg = [(input_c, num_filters, 2, False, True)]
    for i in range(n_down):
        cfg.append((num_filters * 2 ** i, num_filters * 2 ** (i + 1),
                    1 if i == n_down - 1 else 2, True, True))
    cfg.append((num_filters * 2 ** n_down, 1, 1, False, False))

    layers = []
    for idx, (ci, co, s, norm, act) in enumerate(cfg):
        key, kw, kg = jax.random.split(key, 3)
        w = xavier_normal_conv(kw, (co, ci, 4, 4), gain)
        K = 16 * ci
        K_pad, tk = _k_tiles(K)
        Cpad = _cpad(co)
        w2d = jnp.transpose(w, (2, 3, 1, 0)).reshape(K, co).astype(jnp.bfloat16)
        w_bf = jnp.pad(w2d, ((0, K_pad - K), (0, Cpad - co)))
        layer = dict(w_bf=w_bf, K=K, K_pad=K_pad, tk=tk, Cout=co, Cpad=Cpad,
                     stride=s, norm=norm, act=act,
                     out_dtype=(jnp.float32 if idx == len(cfg) - 1 else jnp.bfloat16))
        if norm:
            gamma = 1.0 + gain * jax.random.normal(kg, (co,), dtype=jnp.float32)  # N(1, .02)
            beta = jnp.zeros((co,), jnp.float32)                                   # BN bias = 0
            layer['gamma'] = jnp.pad(gamma, (0, Cpad - co))
            layer['beta'] = jnp.pad(beta, (0, Cpad - co))
        else:
            layer['b2d'] = jnp.zeros((1, Cpad), jnp.float32)                       # conv bias = 0
        layers.append(layer)
    return layers


def patch_discriminator(layers, x_nchw):
    x = jnp.transpose(x_nchw, (0, 2, 3, 1)).astype(jnp.bfloat16)   # NCHW -> NHWC once
    for lyr in layers:
        x = conv_block(x, lyr)
    return jnp.transpose(x, (0, 3, 1, 2)).astype(jnp.float32)       # NCHW f32 logits


class MainModelPallas:
    """Forward-only mirror of MainModel's compute graph."""

    def __init__(self, key, lambda_L1=100.0):
        self.lambda_L1 = lambda_L1
        self.dis_params = init_discriminator_params(key)
        self._fake_preds = None

    def channeling_input(self, data):
        self.L = data['L']
        self.ab = data['ab']

    def forward(self, fake_color):
        # MainModel.forward(): self.fake_color = self.gen(self.L)
        # TODO(synk): gen is external (None by default); stand-in output is supplied.
        self.fake_color = fake_color
        self._fake_preds = None

    def d_losses(self):
        # Fake and real are run as two separate discriminator passes (not a
        # concatenated batch): train-mode BatchNorm uses per-forward batch stats.
        # TODO(synk): batch them along M with per-half BN stat partials.
        fake_image = jnp.concatenate([self.L, self.fake_color], axis=1)
        real_image = jnp.concatenate([self.L, self.ab], axis=1)
        fake_preds = patch_discriminator(self.dis_params, fake_image)
        real_preds = patch_discriminator(self.dis_params, real_image)
        self._fake_preds = fake_preds            # reuse in g_losses (same forward value)
        loss_D_fake = bce_with_logits_mean(fake_preds, False)
        loss_D_real = bce_with_logits_mean(real_preds, True)
        return fake_preds, real_preds, 0.5 * (loss_D_fake + loss_D_real)

    def g_losses(self):
        if self._fake_preds is None:
            fake_image = jnp.concatenate([self.L, self.fake_color], axis=1)
            self._fake_preds = patch_discriminator(self.dis_params, fake_image)
        loss_G_GAN = bce_with_logits_mean(self._fake_preds, True)
        loss_G_L1 = l1_mean(self.fake_color, self.ab) * self.lambda_L1
        return loss_G_GAN + loss_G_L1


# -------------------------------------------------------------------- main ----

if __name__ == "__main__":
    key = jax.random.PRNGKey(0)
    k_L, k_ab, k_fake, k_params = jax.random.split(key, 4)

    N, H, W = 2, 32, 32                       # small but valid for 5 conv-k4 layers
    L = jax.random.normal(k_L, (N, 1, H, W), dtype=jnp.float32)
    ab = jax.random.normal(k_ab, (N, 2, H, W), dtype=jnp.float32)
    fake_color = jax.random.normal(k_fake, (N, 2, H, W), dtype=jnp.float32)

    model = MainModelPallas(k_params, lambda_L1=100.0)
    model.channeling_input({'L': L, 'ab': ab})
    model.forward(fake_color)

    fake_preds, real_preds, loss_D = model.d_losses()
    loss_G = model.g_losses()

    jax.block_until_ready((fake_preds, real_preds, loss_D, loss_G))
    assert fake_preds.shape == (N, 1, H // 8 - 2, W // 8 - 2)
    assert real_preds.shape == fake_preds.shape
    assert jnp.isfinite(loss_D) and jnp.isfinite(loss_G)
    print("KERNEL_OK")
</pallas_src>

<mosaic_0001>
module attributes {stable_mosaic.version = 11 : i64} {
  func.func @kernel(%arg0: i32, %arg1: i32, %arg2: memref<512x48xbf16, #tpu.memory_space<vmem>>, %arg3: memref<48x64xbf16, #tpu.memory_space<vmem>>, %arg4: memref<1x64xf32, #tpu.memory_space<vmem>>, %arg5: memref<512x64xbf16, #tpu.memory_space<vmem>>, %arg6: memref<512x64xf32, #tpu.memory_space<vmem>>) attributes {dimension_semantics = [#tpu.dimension_semantics<parallel>, #tpu.dimension_semantics<arbitrary>], iteration_bounds = array<i64: 1, 1>, scalar_prefetch = 0 : i64, scratch_operands = 1 : i64, tpu.core_type = #tpu.core_type<tc>, window_params = [{transform_indices = @transform_0, window_bounds = array<i64: 512, 48>}, {transform_indices = @transform_1, window_bounds = array<i64: 48, 64>}, {pipeline_mode = #tpu.pipeline_mode<synchronous>, transform_indices = @transform_2, window_bounds = array<i64: 1, 64>}, {transform_indices = @transform_3, window_bounds = array<i64: 512, 64>}]} {
    %c0_i32 = arith.constant 0 : i32
    %0 = arith.cmpi eq, %arg1, %c0_i32 : i32
    %1 = arith.extui %0 : i1 to i32
    %c0_i32_0 = arith.constant 0 : i32
    %2 = arith.cmpi ne, %1, %c0_i32_0 : i32
    scf.if %2 {
      %cst_10 = arith.constant 0.000000e+00 : f32
      %12 = vector.broadcast %cst_10 : f32 to vector<512x64xf32>
      %c0_11 = arith.constant 0 : index
      %c0_12 = arith.constant 0 : index
      %13 = vector.load %arg6[%c0_11, %c0_12] : memref<512x64xf32, #tpu.memory_space<vmem>>, vector<512x64xf32>
      tpu.vector_store %arg6[%c0_11, %c0_12], %12 {strides = array<i32>} : memref<512x64xf32, #tpu.memory_space<vmem>>, vector<512x64xf32>,
    } else {
    }
    %c0 = arith.constant 0 : index
    %c0_1 = arith.constant 0 : index
    %3 = vector.load %arg6[%c0, %c0_1] : memref<512x64xf32, #tpu.memory_space<vmem>>, vector<512x64xf32>
    %c0_2 = arith.constant 0 : index
    %c0_3 = arith.constant 0 : index
    %4 = vector.load %arg2[%c0_2, %c0_3] : memref<512x48xbf16, #tpu.memory_space<vmem>>, vector<512x48xbf16>
    %c0_4 = arith.constant 0 : index
    %c0_5 = arith.constant 0 : index
    %5 = vector.load %arg3[%c0_4, %c0_5] : memref<48x64xbf16, #tpu.memory_space<vmem>>, vector<48x64xbf16>
    %cst = arith.constant dense<0.000000e+00> : vector<512x64xf32>
    %6 = tpu.matmul %4, %5, %cst {dimension_numbers = #tpu.dot_dimension_numbers<[1], [0], [0], [1], [0, 0, 1, 1], [], []>} : vector<512x48xbf16>, vector<48x64xbf16>, vector<512x64xf32> -> vector<512x64xf32>
    %7 = arith.addf %3, %6 : vector<512x64xf32>
    %c0_6 = arith.constant 0 : index
    %c0_7 = arith.constant 0 : index
    %8 = vector.load %arg6[%c0_6, %c0_7] : memref<512x64xf32, #tpu.memory_space<vmem>>, vector<512x64xf32>
    tpu.vector_store %arg6[%c0_6, %c0_7], %7 {strides = array<i32>} : memref<512x64xf32, #tpu.memory_space<vmem>>, vector<512x64xf32>,
    %c0_i32_8 = arith.constant 0 : i32
    %9 = arith.cmpi eq, %arg1, %c0_i32_8 : i32
    %10 = arith.extui %9 : i1 to i32
    %c0_i32_9 = arith.constant 0 : i32
    %11 = arith.cmpi ne, %10, %c0_i32_9 : i32
    scf.if %11 {
      %c0_10 = arith.constant 0 : index
      %c0_11 = arith.constant 0 : index
      %12 = vector.load %arg6[%c0_10, %c0_11] : memref<512x64xf32, #tpu.memory_space<vmem>>, vector<512x64xf32>
      %c0_12 = arith.constant 0 : index
      %c0_13 = arith.constant 0 : index
      %13 = vector.load %arg4[%c0_12, %c0_13] : memref<1x64xf32, #tpu.memory_space<vmem>>, vector<1x64xf32>
      %14 = vector.broadcast %13 : vector<1x64xf32> to vector<512x64xf32>
      %15 = arith.addf %12, %14 : vector<512x64xf32>
      %cst_14 = arith.constant 0.000000e+00 : f32
      %16 = vector.broadcast %cst_14 : f32 to vector<512x64xf32>
      %17 = arith.cmpf ogt, %15, %16 : vector<512x64xf32>
      %cst_15 = arith.constant 2.000000e-01 : f32
      %18 = vector.broadcast %cst_15 : f32 to vector<512x64xf32>
      %19 = arith.mulf %18, %15 : vector<512x64xf32>
      %20 = arith.select %17, %15, %19 : vector<512x64xi1>, vector<512x64xf32>
      %21 = arith.truncf %20 : vector<512x64xf32> to vector<512x64xbf16>
      %c0_16 = arith.constant 0 : index
      %c0_17 = arith.constant 0 : index
      %22 = vector.load %arg5[%c0_16, %c0_17] : memref<512x64xbf16, #tpu.memory_space<vmem>>, vector<512x64xbf16>
      tpu.vector_store %arg5[%c0_16, %c0_17], %21 {strides = array<i32>} : memref<512x64xbf16, #tpu.memory_space<vmem>>, vector<512x64xbf16>,
    } else {
    }
    return
  }
  func.func @transform_0(%arg0: i32, %arg1: i32) -> (i32, i32) {
    %c0_i32 = arith.constant 0 : i32
    return %arg0, %arg1 : i32, i32
  }
  func.func @transform_1(%arg0: i32, %arg1: i32) -> (i32, i32) {
    %c0_i32 = arith.constant 0 : i32
    %c0_i32_0 = arith.constant 0 : i32
    return %arg1, %c0_i32 : i32, i32
  }
  func.func @transform_2(%arg0: i32, %arg1: i32) -> (i32, i32) {
    %c0_i32 = arith.constant 0 : i32
    %c0_i32_0 = arith.constant 0 : i32
    %c0_i32_1 = arith.constant 0 : i32
    return %c0_i32, %c0_i32_0 : i32, i32
  }
  func.func @transform_3(%arg0: i32, %arg1: i32) -> (i32, i32) {
    %c0_i32 = arith.constant 0 : i32
    %c0_i32_0 = arith.constant 0 : i32
    return %arg0, %c0_i32 : i32, i32
  }
}

</mosaic_0001>

<bundles_post_ra>
// kernel: tpu_custom_call.1
= control target key start
LH: loop header
LB: loop body
LE: loop exit
PB: predicated region body
PF: predicated region fallthrough
CT: control target
= control target key end

     0   :  { %vm19_vm0 = vcmask 523264   ;;  %v1910_v1 = vmov 0.0   ;;  %vm396_vm1 = vcmask 392192   ;;  %vm1497_vm2 = vcmask 519168   ;;  %s2705_s1 = inlined_call_operand.vmem [shape: bf16[48,64], index: 1, kind: input, shape index: {}]   ;;  %s2706_s0 = inlined_call_operand.vmem [shape: bf16[512,48], index: 0, kind: input, shape index: {}]   ;;  %s2707_s2 = inlined_call_operand.vmem [shape: f32[1,64], index: 2, kind: input, shape index: {}]   ;;  %s2708_s3 = inlined_call_operand.vmem [shape: bf16[512,64], index: 3, kind: output, shape index: {}]  }
   0x1   :  { %v1934_v0 = vld [vmem:[%s2705_s1 + $0x10] sm:$0xff]   ;;  %22 = vst.msk [vmem:[#allocation2 + $0x10] sm:$0xff] %vm19_vm0, %v1910_v1  ;;  %20 = vst.msk [vmem:[#allocation2] sm:$0xff] %vm19_vm0, %v1910_v1  ;;  %v1875_v2 = vld [vmem:[%s2705_s1 + $0x8] sm:$0xff]  }
   0x2   :  { %21 = vst.msk [vmem:[#allocation2 + $0x8] sm:$0xff] %vm19_vm0, %v1910_v1  ;;  %23 = vst.msk [vmem:[#allocation2 + $0x18] sm:$0xff] %vm19_vm0, %v1910_v1  ;;  %1797 = vmatprep.subr.bf16.mxu0 %v1934_v0  ;;  %1867 = vmatprep.subr.bf16.mxu1 %v1934_v0  ;;  %v1876_v3 = vld [vmem:[%s2705_s1] sm:$0xff]   ;;  %v1879_v6 = vld [vmem:[%s2706_s0 + $0x8] sm:$0xff]  }
   0x3   :  { %24 = vst.msk [vmem:[#allocation2 + $0x20] sm:$0xff] %vm19_vm0, %v1910_v1  ;;  %25 = vst.msk [vmem:[#allocation2 + $0x28] sm:$0xff] %vm19_vm0, %v1910_v1  ;;  %1798 = vmatpush3.bf16.msra.mxu0 %v1934_v0  ;;  %1870 = vmatpush3.bf16.msra.mxu1 %v1934_v0  ;;  %v1877_v4 = vld [vmem:[%s2706_s0] sm:$0xff]   ;;  %v1880_v7 = vld [vmem:[%s2706_s0 + $0x88] sm:$0xff]  }
   0x4   :  { %26 = vst.msk [vmem:[#allocation2 + $0x30] sm:$0xff] %vm19_vm0, %v1910_v1  ;;  %27 = vst.msk [vmem:[#allocation2 + $0x38] sm:$0xff] %vm19_vm0, %v1910_v1  ;;  %1799 = vmatprep.subr.bf16.mxu0 %v1875_v2  ;;  %1868 = vmatprep.subr.bf16.mxu1 %v1875_v2  ;;  %v1878_v5 = vld [vmem:[%s2706_s0 + $0x80] sm:$0xff]   ;;  %v1881_v8 = vld [vmem:[%s2706_s0 + $0x10] sm:$0xff]  }
   0x5   :  { %28 = vst.msk [vmem:[#allocation2 + $0x40] sm:$0xff] %vm19_vm0, %v1910_v1  ;;  %29 = vst.msk [vmem:[#allocation2 + $0x48] sm:$0xff] %vm19_vm0, %v1910_v1  ;;  %1803 = vmatprep.mubr.msk.bf16.mxu0 %vm396_vm1, %v1877_v4  ;;  %1835 = vmatprep.mubr.msk.bf16.mxu1 %vm396_vm1, %v1878_v5  ;;  %v1882_v9 = vld [vmem:[%s2706_s0 + $0x90] sm:$0xff]   ;;  %v1883_v10 = vld [vmem:[%s2706_s0 + $0x18] sm:$0xff]  }
   0x6   :  { %30 = vst.msk [vmem:[#allocation2 + $0x50] sm:$0xff] %vm19_vm0, %v1910_v1  ;;  %31 = vst.msk [vmem:[#allocation2 + $0x58] sm:$0xff] %vm19_vm0, %v1910_v1  ;;  %v1884_v11 = vld [vmem:[%s2706_s0 + $0x98] sm:$0xff]   ;;  %v1885_v12 = vld [vmem:[%s2706_s0 + $0x20] sm:$0xff]  }
   0x7   :  { %32 = vst.msk [vmem:[#allocation2 + $0x60] sm:$0xff] %vm19_vm0, %v1910_v1  ;;  %33 = vst.msk [vmem:[#allocation2 + $0x68] sm:$0xff] %vm19_vm0, %v1910_v1  ;;  %1800 = vmatpush3.bf16.msra.mxu0 %v1875_v2  ;;  %1871 = vmatpush3.bf16.msra.mxu1 %v1875_v2  ;;  %v1886_v13 = vld [vmem:[%s2706_s0 + $0xa0] sm:$0xff]   ;;  %v1887_v14 = vld [vmem:[%s2706_s0 + $0x28] sm:$0xff]  }
   0x8   :  { %34 = vst.msk [vmem:[#allocation2 + $0x70] sm:$0xff] %vm19_vm0, %v1910_v1  ;;  %35 = vst.msk [vmem:[#allocation2 + $0x78] sm:$0xff] %vm19_vm0, %v1910_v1  ;;  %1801 = vmatprep.subr.bf16.mxu0 %v1876_v3  ;;  %1869 = vmatprep.subr.bf16.mxu1 %v1876_v3  ;;  %v1888_v15 = vld [vmem:[%s2706_s0 + $0xa8] sm:$0xff]   ;;  %v1889_v16 = vld [vmem:[%s2706_s0 + $0x30] sm:$0xff]  }
   0x9   :  { %36 = vst.msk [vmem:[#allocation2 + $0x80] sm:$0xff] %vm19_vm0, %v1910_v1  ;;  %37 = vst.msk [vmem:[#allocation2 + $0x88] sm:$0xff] %vm19_vm0, %v1910_v1  ;;  %v1890_v17 = vld [vmem:[%s2706_s0 + $0xb0] sm:$0xff]   ;;  %v1891_v18 = vld [vmem:[%s2706_s0 + $0x38] sm:$0xff]  }
   0xa   :  { %38 = vst.msk [vmem:[#allocation2 + $0x90] sm:$0xff] %vm19_vm0, %v1910_v1  ;;  %39 = vst.msk [vmem:[#allocation2 + $0x98] sm:$0xff] %vm19_vm0, %v1910_v1  ;;  %v1892_v19 = vld [vmem:[%s2706_s0 + $0xb8] sm:$0xff]   ;;  %v1893_v20 = vld [vmem:[%s2706_s0 + $0x40] sm:$0xff]  }
   0xb   :  { %40 = vst.msk [vmem:[#allocation2 + $0xa0] sm:$0xff] %vm19_vm0, %v1910_v1  ;;  %41 = vst.msk [vmem:[#allocation2 + $0xa8] sm:$0xff] %vm19_vm0, %v1910_v1  ;;  %1802 = vmatpush3.bf16.msra.mxu0 %v1876_v3  ;;  %1872 = vmatpush3.bf16.msra.mxu1 %v1876_v3  ;;  %v1894_v21 = vld [vmem:[%s2706_s0 + $0xc0] sm:$0xff]   ;;  %v1895_v22 = vld [vmem:[%s2706_s0 + $0x48] sm:$0xff]  }
   0xc   :  { %42 = vst.msk [vmem:[#allocation2 + $0xb0] sm:$0xff] %vm19_vm0, %v1910_v1  ;;  %43 = vst.msk [vmem:[#allocation2 + $0xb8] sm:$0xff] %vm19_vm0, %v1910_v1  ;;  %v1896_v23 = vld [vmem:[%s2706_s0 + $0xc8] sm:$0xff]   ;;  %v1897_v24 = vld [vmem:[%s2706_s0 + $0x50] sm:$0xff]  }
   0xd   :  { %44 = vst.msk [vmem:[#allocation2 + $0xc0] sm:$0xff] %vm19_vm0, %v1910_v1  ;;  %45 = vst.msk [vmem:[#allocation2 + $0xc8] sm:$0xff] %vm19_vm0, %v1910_v1  ;;  %v1898_v25 = vld [vmem:[%s2706_s0 + $0xd0] sm:$0xff]   ;;  %v1899_v26 = vld [vmem:[%s2706_s0 + $0x58] sm:$0xff]  }
   0xe   :  { %46 = vst.msk [vmem:[#allocation2 + $0xd0] sm:$0xff] %vm19_vm0, %v1910_v1  ;;  %47 = vst.msk [vmem:[#allocation2 + $0xd8] sm:$0xff] %vm19_vm0, %v1910_v1  ;;  %1804 = vmatmul.mubr.msk.bf16.vlgmr.msra.gmra.mxu0 %vm396_vm1, %v1879_v6  ;;  %1836 = vmatmul.mubr.msk.bf16.vlgmr.msra.gmra.mxu1 %vm396_vm1, %v1880_v7  ;;  %v1900_v27 = vld [vmem:[%s2706_s0 + $0xd8] sm:$0xff]   ;;  %v1901_v28 = vld [vmem:[%s2706_s0 + $0x60] sm:$0xff]  }
   0xf   :  { %48 = vst.msk [vmem:[#allocation2 + $0xe0] sm:$0xff] %vm19_vm0, %v1910_v1  ;;  %49 = vst.msk [vmem:[#allocation2 + $0xe8] sm:$0xff] %vm19_vm0, %v1910_v1  ;;  %1807 = vmatprep.mubr.msk.bf16.mxu0 %vm396_vm1, %v1881_v8  ;;  %1839 = vmatprep.mubr.msk.bf16.mxu1 %vm396_vm1, %v1882_v9  ;;  %v1902_v29 = vld [vmem:[%s2706_s0 + $0xe0] sm:$0xff]   ;;  %v1903_v30 = vld [vmem:[%s2706_s0 + $0x68] sm:$0xff]  }
  0x10   :  { %50 = vst.msk [vmem:[#allocation2 + $0xf0] sm:$0xff] %vm19_vm0, %v1910_v1  ;;  %51 = vst.msk [vmem:[#allocation2 + $0xf8] sm:$0xff] %vm19_vm0, %v1910_v1  ;;  %v1904_v31 = vld [vmem:[%s2706_s0 + $0xe8] sm:$0xff]   ;;  %v1905_v32 = vld [vmem:[%s2706_s0 + $0x70] sm:$0xff]  }
  0x11   :  { %52 = vst.msk [vmem:[#allocation2 + $0x100] sm:$0xff] %vm19_vm0, %v1910_v1  ;;  %53 = vst.msk [vmem:[#allocation2 + $0x108] sm:$0xff] %vm19_vm0, %v1910_v1  ;;  %v1906_v33 = vld [vmem:[%s2706_s0 + $0xf0] sm:$0xff]   ;;  %v1907_v34 = vld [vmem:[%s2706_s0 + $0x78] sm:$0xff]  }
  0x12   :  { %54 = vst.msk [vmem:[#allocation2 + $0x110] sm:$0xff] %vm19_vm0, %v1910_v1  ;;  %55 = vst.msk [vmem:[#allocation2 + $0x118] sm:$0xff] %vm19_vm0, %v1910_v1  ;;  %v1908_v35 = vld [vmem:[%s2706_s0 + $0xf8] sm:$0xff]   ;;  %v86_v36 = vld [vmem:[#allocation2 + $0x10] sm:$0xff] }
  0x13   :  { %56 = vst.msk [vmem:[#allocation2 + $0x120] sm:$0xff] %vm19_vm0, %v1910_v1  ;;  %57 = vst.msk [vmem:[#allocation2 + $0x128] sm:$0xff] %vm19_vm0, %v1910_v1  ;;  %v84_v40 = vld [vmem:[#allocation2] sm:$0xff]  ;;  %v87_v46 = vld [vmem:[#allocation2 + $0x18] sm:$0xff] }
  0x14   :  { %58 = vst.msk [vmem:[#allocation2 + $0x130] sm:$0xff] %vm19_vm0, %v1910_v1  ;;  %59 = vst.msk [vmem:[#allocation2 + $0x138] sm:$0xff] %vm19_vm0, %v1910_v1  ;;  %v85_v52 = vld [vmem:[#allocation2 + $0x8] sm:$0xff]  ;;  %v90_v58 = vld [vmem:[#allocation2 + $0x30] sm:$0xff] }
  0x15   :  { %60 = vst.msk [vmem:[#allocation2 + $0x140] sm:$0xff] %vm19_vm0, %v1910_v1  ;;  %61 = vst.msk [vmem:[#allocation2 + $0x148] sm:$0xff] %vm19_vm0, %v1910_v1  ;;  %v2211_v62 = vld [vmem:[%s2707_s2] ss:$0 sm:$0xff] }
  0x16   :  { %62 = vst.msk [vmem:[#allocation2 + $0x150] sm:$0xff] %vm19_vm0, %v1910_v1  ;;  %63 = vst.msk [vmem:[#allocation2 + $0x158] sm:$0xff] %vm19_vm0, %v1910_v1  ;;  %1808 = vmatmul.mubr.msk.bf16.gmra.mxu0 %vm396_vm1, %v1883_v10  ;;  %1840 = vmatmul.mubr.msk.bf16.gmra.mxu1 %vm396_vm1, %v1884_v11 }
  0x17   :  { %64 = vst.msk [vmem:[#allocation2 + $0x160] sm:$0xff] %vm19_vm0, %v1910_v1  ;;  %65 = vst.msk [vmem:[#allocation2 + $0x168] sm:$0xff] %vm19_vm0, %v1910_v1  ;;  %1811 = vmatprep.mubr.msk.bf16.mxu0 %vm396_vm1, %v1885_v12  ;;  %1843 = vmatprep.mubr.msk.bf16.mxu1 %vm396_vm1, %v1886_v13  ;;  %v91_v13 = vld [vmem:[#allocation2 + $0x38] sm:$0xff] }
  0x18   :  { %66 = vst.msk [vmem:[#allocation2 + $0x170] sm:$0xff] %vm19_vm0, %v1910_v1  ;;  %67 = vst.msk [vmem:[#allocation2 + $0x178] sm:$0xff] %vm19_vm0, %v1910_v1  ;;  %v116_v41 = vld [vmem:[#allocation2 + $0x100] sm:$0xff]  ;;  %v117_v53 = vld [vmem:[#allocation2 + $0x108] sm:$0xff] }
  0x19   :  { %68 = vst.msk [vmem:[#allocation2 + $0x180] sm:$0xff] %vm19_vm0, %v1910_v1  ;;  %69 = vst.msk [vmem:[#allocation2 + $0x188] sm:$0xff] %vm19_vm0, %v1910_v1  ;;  %v118_v37 = vld [vmem:[#allocation2 + $0x110] sm:$0xff]  ;;  %v119_v47 = vld [vmem:[#allocation2 + $0x118] sm:$0xff] }
  0x1a   :  { %70 = vst.msk [vmem:[#allocation2 + $0x190] sm:$0xff] %vm19_vm0, %v1910_v1  ;;  %71 = vst.msk [vmem:[#allocation2 + $0x198] sm:$0xff] %vm19_vm0, %v1910_v1  ;;  %v120_v2 = vld [vmem:[#allocation2 + $0x120] sm:$0xff] }
  0x1b   :  { %72 = vst.msk [vmem:[#allocation2 + $0x1a0] sm:$0xff] %vm19_vm0, %v1910_v1  ;;  %73 = vst.msk [vmem:[#allocation2 + $0x1a8] sm:$0xff] %vm19_vm0, %v1910_v1  ;;  %v122_v59 = vld [vmem:[#allocation2 + $0x130] sm:$0xff] }
  0x1c   :  { %74 = vst.msk [vmem:[#allocation2 + $0x1b0] sm:$0xff] %vm19_vm0, %v1910_v1  ;;  %75 = vst.msk [vmem:[#allocation2 + $0x1b8] sm:$0xff] %vm19_vm0, %v1910_v1 }
  0x1d   :  { %76 = vst.msk [vmem:[#allocation2 + $0x1c0] sm:$0xff] %vm19_vm0, %v1910_v1  ;;  %77 = vst.msk [vmem:[#allocation2 + $0x1c8] sm:$0xff] %vm19_vm0, %v1910_v1 }
  0x1e   :  { %78 = vst.msk [vmem:[#allocation2 + $0x1d0] sm:$0xff] %vm19_vm0, %v1910_v1  ;;  %79 = vst.msk [vmem:[#allocation2 + $0x1d8] sm:$0xff] %vm19_vm0, %v1910_v1  ;;  %1812 = vmatmul.mubr.msk.bf16.gmra.mxu0 %vm396_vm1, %v1887_v14  ;;  %1844 = vmatmul.mubr.msk.bf16.gmra.mxu1 %vm396_vm1, %v1888_v15  ;;  %v123_v14 = vld [vmem:[#allocation2 + $0x138] sm:$0xff] }
  0x1f   :  { %80 = vst.msk [vmem:[#allocation2 + $0x1e0] sm:$0xff] %vm19_vm0, %v1910_v1  ;;  %81 = vst.msk [vmem:[#allocation2 + $0x1e8] sm:$0xff] %vm19_vm0, %v1910_v1  ;;  %1815 = vmatprep.mubr.msk.bf16.mxu0 %vm396_vm1, %v1889_v16  ;;  %1847 = vmatprep.mubr.msk.bf16.mxu1 %vm396_vm1, %v1890_v17 }
  0x20   :  { %82 = vst.msk [vmem:[#allocation2 + $0x1f0] sm:$0xff] %vm19_vm0, %v1910_v1  ;;  %83 = vst.msk [vmem:[#allocation2 + $0x1f8] sm:$0xff] %vm19_vm0, %v1910_v1  ;;  %v88_v1 = vld [vmem:[#allocation2 + $0x20] sm:$0xff] }
  0x26   :  { %1816 = vmatmul.mubr.msk.bf16.gmra.mxu0 %vm396_vm1, %v1891_v18  ;;  %1848 = vmatmul.mubr.msk.bf16.gmra.mxu1 %vm396_vm1, %v1892_v19 }
  0x27   :  { %1819 = vmatprep.mubr.msk.bf16.mxu0 %vm396_vm1, %v1893_v20  ;;  %1851 = vmatprep.mubr.msk.bf16.mxu1 %vm396_vm1, %v1894_v21 }
  0x2e   :  { %1820 = vmatmul.mubr.msk.bf16.gmra.mxu0 %vm396_vm1, %v1895_v22  ;;  %1852 = vmatmul.mubr.msk.bf16.gmra.mxu1 %vm396_vm1, %v1896_v23 }
  0x2f   :  { %1823 = vmatprep.mubr.msk.bf16.mxu0 %vm396_vm1, %v1897_v24  ;;  %1855 = vmatprep.mubr.msk.bf16.mxu1 %vm396_vm1, %v1898_v25 }
  0x36   :  { %1824 = vmatmul.mubr.msk.bf16.gmra.mxu0 %vm396_vm1, %v1899_v26  ;;  %1856 = vmatmul.mubr.msk.bf16.gmra.mxu1 %vm396_vm1, %v1900_v27 }
  0x37   :  { %1827 = vmatprep.mubr.msk.bf16.mxu0 %vm396_vm1, %v1901_v28  ;;  %1859 = vmatprep.mubr.msk.bf16.mxu1 %vm396_vm1, %v1902_v29 }
  0x3e   :  { %1828 = vmatmul.mubr.msk.bf16.gmra.mxu0 %vm396_vm1, %v1903_v30  ;;  %1860 = vmatmul.mubr.msk.bf16.gmra.mxu1 %vm396_vm1, %v1904_v31 }
  0x3f   :  { %1831 = vmatprep.mubr.msk.bf16.mxu0 %vm396_vm1, %v1905_v32  ;;  %1863 = vmatprep.mubr.msk.bf16.mxu1 %vm396_vm1, %v1906_v33 }
  0x46   :  { %1832 = vmatmul.mubr.msk.bf16.gmra.mxu0 %vm396_vm1, %v1907_v34  ;;  %1864 = vmatmul.mubr.msk.bf16.gmra.mxu1 %vm396_vm1, %v1908_v35 }
  0xce   :  { %v1805_v38 = vpop.f32.mrf.mxu0  ;;  %v1837_v39 = vpop.f32.mrf.mxu1 }
  0xcf   :  { %v784_v42 = vadd.f32 %v1805_v38, %v86_v36  ;;  %v816_v43 = vadd.f32 %v1837_v39, %v118_v37 }
  0xd0   :  { %v527_v44 = vpop.f32.mrf.mxu0  ;;  %v655_v45 = vpop.f32.mrf.mxu1 }
  0xd1   :  { %849 = vst.msk [vmem:[#allocation2 + $0x10] sm:$0xff] %vm19_vm0, %v784_v42  ;;  %881 = vst.msk [vmem:[#allocation2 + $0x110] sm:$0xff] %vm19_vm0, %v816_v43  ;;  %v782_v48 = vadd.f32 %v527_v44, %v84_v40  ;;  %v814_v49 = vadd.f32 %v655_v45, %v116_v41 }
  0xd2   :  { %v1806_v50 = vpop.f32.mrf.mxu0  ;;  %v1838_v51 = vpop.f32.mrf.mxu1 }
  0xd3   :  { %847 = vst.msk [vmem:[#allocation2] sm:$0xff] %vm19_vm0, %v782_v48  ;;  %879 = vst.msk [vmem:[#allocation2 + $0x100] sm:$0xff] %vm19_vm0, %v814_v49  ;;  %v785_v54 = vadd.f32 %v1806_v50, %v87_v46  ;;  %v817_v55 = vadd.f32 %v1838_v51, %v119_v47 }
  0xd4   :  { %v530_v56 = vpop.f32.mrf.mxu0  ;;  %v658_v57 = vpop.f32.mrf.mxu1 }
  0xd5   :  { %850 = vst.msk [vmem:[#allocation2 + $0x18] sm:$0xff] %vm19_vm0, %v785_v54  ;;  %882 = vst.msk [vmem:[#allocation2 + $0x118] sm:$0xff] %vm19_vm0, %v817_v55  ;;  %v783_v60 = vadd.f32 %v530_v56, %v85_v52  ;;  %v815_v61 = vadd.f32 %v658_v57, %v117_v53  ;;  %v89_v53 = vld [vmem:[#allocation2 + $0x28] sm:$0xff] }
  0xd6   :  { %v1809_v63 = vpop.f32.mrf.mxu0  ;;  %v1841_v0 = vpop.f32.mrf.mxu1 }
  0xd7   :  { %848 = vst.msk [vmem:[#allocation2 + $0x8] sm:$0xff] %vm19_vm0, %v783_v60  ;;  %880 = vst.msk [vmem:[#allocation2 + $0x108] sm:$0xff] %vm19_vm0, %v815_v61  ;;  %v788_v3 = vadd.f32 %v1809_v63, %v90_v58  ;;  %v820_v4 = vadd.f32 %v1841_v0, %v122_v59  ;;  %v121_v59 = vld [vmem:[#allocation2 + $0x128] sm:$0xff] }
  0xd8   :  { %v916_v5 = vld [vmem:[#allocation2 + $0x10] sm:$0xff]  ;;  %v543_v7 = vpop.f32.mrf.mxu0  ;;  %v671_v8 = vpop.f32.mrf.mxu1 }
  0xd9   :  { %v948_v6 = vld [vmem:[#allocation2 + $0x110] sm:$0xff]  ;;  %v987_v9 = vadd.f32 %v2211_v62, %v916_v5  ;;  %853 = vst.msk [vmem:[#allocation2 + $0x30] sm:$0xff] %vm19_vm0, %v788_v3  ;;  %885 = vst.msk [vmem:[#allocation2 + $0x130] sm:$0xff] %vm19_vm0, %v820_v4  ;;  %v786_v11 = vadd.f32 %v543_v7, %v88_v1  ;;  %v818_v12 = vadd.f32 %v671_v8, %v120_v2 }
  0xda   :  { %v1019_v10 = vadd.f32 %v2211_v62, %v948_v6  ;;  %v914_v15 = vld [vmem:[#allocation2] sm:$0xff]  ;;  %v1810_v17 = vpop.f32.mrf.mxu0  ;;  %v1842_v18 = vpop.f32.mrf.mxu1 }
  0xdb   :  { %v946_v16 = vld [vmem:[#allocation2 + $0x100] sm:$0xff]  ;;  %vm1051_vm3 = vcmp.gt.f32.partialorder %v987_v9, 0.0  ;;  %v1115_v19 = vmul.f32 0.2, %v987_v9  ;;  %851 = vst.msk [vmem:[#allocation2 + $0x20] sm:$0xff] %vm19_vm0, %v786_v11  ;;  %883 = vst.msk [vmem:[#allocation2 + $0x120] sm:$0xff] %vm19_vm0, %v818_v12  ;;  %v985_v21 = vadd.f32 %v2211_v62, %v914_v15  ;;  %v789_v25 = vadd.f32 %v1810_v17, %v91_v13 }
  0xdc   :  { %vm1083_vm4 = vcmp.gt.f32.partialorder %v1019_v10, 0.0  ;;  %v1147_v20 = vmul.f32 0.2, %v1019_v10  ;;  %v1017_v22 = vadd.f32 %v2211_v62, %v946_v16  ;;  %v917_v23 = vld [vmem:[#allocation2 + $0x18] sm:$0xff]  ;;  %v821_v26 = vadd.f32 %v1842_v18, %v123_v14  ;;  %v546_v27 = vpop.f32.mrf.mxu0  ;;  %v674_v28 = vpop.f32.mrf.mxu1 }
  0xdd   :  { %v949_v24 = vld [vmem:[#allocation2 + $0x118] sm:$0xff]  ;;  %v1179_v29 = vsel %vm1051_vm3, %v987_v9, %v1115_v19  ;;  %v988_v31 = vadd.f32 %v2211_v62, %v917_v23  ;;  %vm1049_vm5 = vcmp.gt.f32.partialorder %v985_v21, 0.0  ;;  %v1113_v35 = vmul.f32 0.2, %v985_v21  ;;  %854 = vst.msk [vmem:[#allocation2 + $0x38] sm:$0xff] %vm19_vm0, %v789_v25  ;;  %v126_v25 = vld [vmem:[#allocation2 + $0x150] sm:$0xff] }
  0xde   :  { %v1211_v30 = vsel %vm1083_vm4, %v1019_v10, %v1147_v20  ;;  %v1020_v32 = vadd.f32 %v2211_v62, %v949_v24  ;;  %v1700_v33 = vpack.c.bf16 %v1179_v29, %v1179_v29  ;;  %v915_v36 = vld [vmem:[#allocation2 + $0x8] sm:$0xff]  ;;  %886 = vst.msk [vmem:[#allocation2 + $0x138] sm:$0xff] %vm19_vm0, %v821_v26  ;;  %v2227_v38 = vpop.f32.mrf.mxu0  ;;  %v2229_v39 = vpop.f32.mrf.mxu1  ;;  %vm1081_vm6 = vcmp.gt.f32.partialorder %v1017_v22, 0.0  ;;  %v94_v24 = vld [vmem:[#allocation2 + $0x50] sm:$0xff] }
  0xdf   :  { %v1732_v34 = vpack.c.bf16 %v1211_v30, %v1211_v30  ;;  %v947_v37 = vld [vmem:[#allocation2 + $0x108] sm:$0xff]  ;;  %v1145_v40 = vmul.f32 0.2, %v1017_v22  ;;  %vm1052_vm7 = vcmp.gt.f32.partialorder %v988_v31, 0.0  ;;  %v1116_v41 = vmul.f32 0.2, %v988_v31 }
  0xe0   :  { %1500 = vst.msk [vmem:[%s2708_s3 + $0x8] sm:$0xf] %vm1497_vm2, %v1700_v33  ;;  %v1177_v42 = vsel %vm1049_vm5, %v985_v21, %v1113_v35  ;;  %vm1084_vm8 = vcmp.gt.f32.partialorder %v1020_v32, 0.0  ;;  %v1148_v43 = vmul.f32 0.2, %v1020_v32  ;;  %v986_v44 = vadd.f32 %v2211_v62, %v915_v36  ;;  %v2240_v45 = vpop.f32.mrf.mxu0  ;;  %v2242_v46 = vpop.f32.mrf.mxu1  ;;  %v920_v51 = vld [vmem:[#allocation2 + $0x30] sm:$0xff] }
  0xe1   :  { %1532 = vst.msk [vmem:[%s2708_s3 + $0x88] sm:$0xf] %vm1497_vm2, %v1732_v34  ;;  %v1698_v47 = vpack.c.bf16 %v1177_v42, %v1177_v42  ;;  %v1209_v48 = vsel %vm1081_vm6, %v1017_v22, %v1145_v40  ;;  %v1180_v49 = vsel %vm1052_vm7, %v988_v31, %v1116_v41  ;;  %v1018_v50 = vadd.f32 %v2211_v62, %v947_v37  ;;  %v952_v52 = vld [vmem:[#allocation2 + $0x130] sm:$0xff]  ;;  %v124_v33 = vld [vmem:[#allocation2 + $0x140] sm:$0xff]  ;;  %v95_v34 = vld [vmem:[#allocation2 + $0x58] sm:$0xff] }
  0xe2   :  { %v1730_v54 = vpack.c.bf16 %v1209_v48, %v1209_v48  ;;  %v1701_v55 = vpack.c.bf16 %v1180_v49, %v1180_v49  ;;  %v1212_v56 = vsel %vm1084_vm8, %v1020_v32, %v1148_v43  ;;  %vm1050_vm9 = vcmp.gt.f32.partialorder %v986_v44, 0.0  ;;  %v918_v57 = vld [vmem:[#allocation2 + $0x20] sm:$0xff]  ;;  %v2245_v60 = vpop.f32.mrf.mxu0  ;;  %v2247_v61 = vpop.f32.mrf.mxu1  ;;  %v127_v40 = vld [vmem:[#allocation2 + $0x158] sm:$0xff]  ;;  %v93_v41 = vld [vmem:[#allocation2 + $0x48] sm:$0xff] }
  0xe3   :  { %v950_v58 = vld [vmem:[#allocation2 + $0x120] sm:$0xff]  ;;  %1498 = vst.msk [vmem:[%s2708_s3] sm:$0xf] %vm1497_vm2, %v1698_v47  ;;  %v1733_v63 = vpack.c.bf16 %v1212_v56, %v1212_v56  ;;  %v1114_v0 = vmul.f32 0.2, %v986_v44  ;;  %vm1082_vm10 = vcmp.gt.f32.partialorder %v1018_v50, 0.0  ;;  %v991_v2 = vadd.f32 %v2211_v62, %v920_v51 }
  0xe4   :  { %v1146_v1 = vmul.f32 0.2, %v1018_v50  ;;  %1530 = vst.msk [vmem:[%s2708_s3 + $0x80] sm:$0xf] %vm1497_vm2, %v1730_v54  ;;  %1501 = vst.msk [vmem:[%s2708_s3 + $0xc] sm:$0xf] %vm1497_vm2, %v1701_v55  ;;  %v1023_v3 = vadd.f32 %v2211_v62, %v952_v52  ;;  %v989_v4 = vadd.f32 %v2211_v62, %v918_v57  ;;  %v1021_v5 = vadd.f32 %v2211_v62, %v950_v58  ;;  %v2265_v6 = vpop.f32.mrf.mxu0  ;;  %v2267_v7 = vpop.f32.mrf.mxu1 }
  0xe5   :  { %1533 = vst.msk [vmem:[%s2708_s3 + $0x8c] sm:$0xf] %vm1497_vm2, %v1733_v63  ;;  %v1178_v8 = vsel %vm1050_vm9, %v986_v44, %v1114_v0  ;;  %v921_v10 = vld [vmem:[#allocation2 + $0x38] sm:$0xff]  ;;  %v787_v11 = vadd.f32 %v546_v27, %v89_v53  ;;  %v819_v12 = vadd.f32 %v674_v28, %v121_v59  ;;  %vm1055_vm11 = vcmp.gt.f32.partialorder %v991_v2, 0.0  ;;  %v92_v32 = vld [vmem:[#allocation2 + $0x40] sm:$0xff]  ;;  %v125_v42 = vld [vmem:[#allocation2 + $0x148] sm:$0xff] }
  0xe6   :  { %v1210_v9 = vsel %vm1082_vm10, %v1018_v50, %v1146_v1  ;;  %v1699_v13 = vpack.c.bf16 %v1178_v8, %v1178_v8  ;;  %v1119_v15 = vmul.f32 0.2, %v991_v2  ;;  %v953_v16 = vld [vmem:[#allocation2 + $0x138] sm:$0xff]  ;;  %v2274_v17 = vpop.f32.mrf.mxu0  ;;  %v2276_v18 = vpop.f32.mrf.mxu1  ;;  %vm1087_vm12 = vcmp.gt.f32.partialorder %v1023_v3, 0.0  ;;  %v98_v50 = vld [vmem:[#allocation2 + $0x70] sm:$0xff]  ;;  %v96_v56 = vld [vmem:[#allocation2 + $0x60] sm:$0xff] }
  0xe7   :  { %v1731_v14 = vpack.c.bf16 %v1210_v9, %v1210_v9  ;;  %v1151_v19 = vmul.f32 0.2, %v1023_v3  ;;  %vm1053_vm13 = vcmp.gt.f32.partialorder %v989_v4, 0.0  ;;  %v1117_v20 = vmul.f32 0.2, %v989_v4  ;;  %852 = vst.msk [vmem:[#allocation2 + $0x28] sm:$0xff] %vm19_vm0, %v787_v11 }
  0xe8   :  { %884 = vst.msk [vmem:[#allocation2 + $0x128] sm:$0xff] %vm19_vm0, %v819_v12  ;;  %v1183_v21 = vsel %vm1055_vm11, %v991_v2, %v1119_v15  ;;  %vm1085_vm14 = vcmp.gt.f32.partialorder %v1021_v5, 0.0  ;;  %v1149_v22 = vmul.f32 0.2, %v1021_v5  ;;  %v992_v23 = vadd.f32 %v2211_v62, %v921_v10  ;;  %v2289_v26 = vpop.f32.mrf.mxu0  ;;  %v2291_v27 = vpop.f32.mrf.mxu1  ;;  %v130_v55 = vld [vmem:[#allocation2 + $0x170] sm:$0xff]  ;;  %v128_v57 = vld [vmem:[#allocation2 + $0x160] sm:$0xff] }
  0xe9   :  { %1499 = vst.msk [vmem:[%s2708_s3 + $0x4] sm:$0xf] %vm1497_vm2, %v1699_v13  ;;  %1531 = vst.msk [vmem:[%s2708_s3 + $0x84] sm:$0xf] %vm1497_vm2, %v1731_v14  ;;  %v1704_v28 = vpack.c.bf16 %v1183_v21, %v1183_v21  ;;  %v1215_v29 = vsel %vm1087_vm12, %v1023_v3, %v1151_v19  ;;  %v1181_v30 = vsel %vm1053_vm13, %v989_v4, %v1117_v20  ;;  %v99_v0 = vld [vmem:[#allocation2 + $0x78] sm:$0xff]  ;;  %v97_v1 = vld [vmem:[#allocation2 + $0x68] sm:$0xff] }
  0xea   :  { %v1024_v31 = vadd.f32 %v2211_v62, %v953_v16  ;;  %v1736_v35 = vpack.c.bf16 %v1215_v29, %v1215_v29  ;;  %v1702_v36 = vpack.c.bf16 %v1181_v30, %v1181_v30  ;;  %v1213_v37 = vsel %vm1085_vm14, %v1021_v5, %v1149_v22  ;;  %v1818_v43 = vpop.f32.mrf.mxu0  ;;  %v1850_v44 = vpop.f32.mrf.mxu1  ;;  %v102_v15 = vld [vmem:[#allocation2 + $0x90] sm:$0xff]  ;;  %v132_v21 = vld [vmem:[#allocation2 + $0x180] sm:$0xff] }
  0xeb   :  { %vm1056_vm15 = vcmp.gt.f32.partialorder %v992_v23, 0.0  ;;  %1504 = vst.msk [vmem:[%s2708_s3 + $0x18] sm:$0xf] %vm1497_vm2, %v1704_v28  ;;  %v1734_v47 = vpack.c.bf16 %v1213_v37, %v1213_v37  ;;  %v1120_v48 = vmul.f32 0.2, %v992_v23  ;;  %v792_v51 = vadd.f32 %v2227_v38, %v94_v24  ;;  %v134_v16 = vld [vmem:[#allocation2 + $0x190] sm:$0xff] }
  0xec   :  { %vm1088_vm1 = vcmp.gt.f32.partialorder %v1024_v31, 0.0  ;;  %v1152_v49 = vmul.f32 0.2, %v1024_v31  ;;  %1536 = vst.msk [vmem:[%s2708_s3 + $0x98] sm:$0xf] %vm1497_vm2, %v1736_v35  ;;  %v824_v52 = vadd.f32 %v2229_v39, %v126_v25  ;;  %v790_v53 = vadd.f32 %v2240_v45, %v92_v32  ;;  %v578_v58 = vpop.f32.mrf.mxu0  ;;  %v706_v59 = vpop.f32.mrf.mxu1  ;;  %v135_v24 = vld [vmem:[#allocation2 + $0x198] sm:$0xff] }
  0xed   :  { %1502 = vst.msk [vmem:[%s2708_s3 + $0x10] sm:$0xf] %vm1497_vm2, %v1702_v36  ;;  %v822_v54 = vadd.f32 %v2242_v46, %v124_v33  ;;  %1534 = vst.msk [vmem:[%s2708_s3 + $0x90] sm:$0xf] %vm1497_vm2, %v1734_v47  ;;  %v1184_v63 = vsel %vm1056_vm15, %v992_v23, %v1120_v48  ;;  %v793_v39 = vadd.f32 %v2245_v60, %v95_v34  ;;  %v131_v46 = vld [vmem:[#allocation2 + $0x178] sm:$0xff]  ;;  %v101_v33 = vld [vmem:[#allocation2 + $0x88] sm:$0xff] }
  0xee   :  { %v1216_v38 = vsel %vm1088_vm1, %v1024_v31, %v1152_v49  ;;  %v825_v45 = vadd.f32 %v2247_v61, %v127_v40  ;;  %v1705_v2 = vpack.c.bf16 %v1184_v63, %v1184_v63  ;;  %v919_v4 = vld [vmem:[#allocation2 + $0x28] sm:$0xff]  ;;  %857 = vst.msk [vmem:[#allocation2 + $0x50] sm:$0xff] %vm19_vm0, %v792_v51  ;;  %889 = vst.msk [vmem:[#allocation2 + $0x150] sm:$0xff] %vm19_vm0, %v824_v52  ;;  %v1821_v9 = vpop.f32.mrf.mxu0  ;;  %v1853_v10 = vpop.f32.mrf.mxu1  ;;  %v103_v23 = vld [vmem:[#allocation2 + $0x98] sm:$0xff] }
  0xef   :  { %v1737_v3 = vpack.c.bf16 %v1216_v38, %v1216_v38  ;;  %v951_v5 = vld [vmem:[#allocation2 + $0x128] sm:$0xff]  ;;  %855 = vst.msk [vmem:[#allocation2 + $0x40] sm:$0xff] %vm19_vm0, %v790_v53  ;;  %887 = vst.msk [vmem:[#allocation2 + $0x140] sm:$0xff] %vm19_vm0, %v822_v54  ;;  %v791_v8 = vadd.f32 %v2265_v6, %v93_v41  ;;  %v823_v60 = vadd.f32 %v2267_v7, %v125_v42  ;;  %v100_v6 = vld [vmem:[#allocation2 + $0x80] sm:$0xff] }
  0xf0   :  { %v129_v61 = vld [vmem:[#allocation2 + $0x168] sm:$0xff]  ;;  %v990_v11 = vadd.f32 %v2211_v62, %v919_v4  ;;  %v1022_v12 = vadd.f32 %v2211_v62, %v951_v5  ;;  %858 = vst.msk [vmem:[#allocation2 + $0x58] sm:$0xff] %vm19_vm0, %v793_v39  ;;  %890 = vst.msk [vmem:[#allocation2 + $0x158] sm:$0xff] %vm19_vm0, %v825_v45  ;;  %v796_v13 = vadd.f32 %v2274_v17, %v98_v50  ;;  %v591_v20 = vpop.f32.mrf.mxu0  ;;  %v719_v22 = vpop.f32.mrf.mxu1  ;;  %v106_v49 = vld [vmem:[#allocation2 + $0xb0] sm:$0xff] }
  0xf1   :  { %v828_v14 = vadd.f32 %v2276_v18, %v130_v55  ;;  %1505 = vst.msk [vmem:[%s2708_s3 + $0x1c] sm:$0xf] %vm1497_vm2, %v1705_v2  ;;  %1537 = vst.msk [vmem:[%s2708_s3 + $0x9c] sm:$0xf] %vm1497_vm2, %v1737_v3  ;;  %v794_v7 = vadd.f32 %v2289_v26, %v96_v56  ;;  %v826_v17 = vadd.f32 %v2291_v27, %v128_v57  ;;  %v133_v34 = vld [vmem:[#allocation2 + $0x188] sm:$0xff] }
  0xf2   :  { %856 = vst.msk [vmem:[#allocation2 + $0x48] sm:$0xff] %vm19_vm0, %v791_v8  ;;  %888 = vst.msk [vmem:[#allocation2 + $0x148] sm:$0xff] %vm19_vm0, %v823_v60  ;;  %v797_v18 = vadd.f32 %v1818_v43, %v99_v0  ;;  %v829_v19 = vadd.f32 %v1850_v44, %v131_v46  ;;  %vm1054_vm3 = vcmp.gt.f32.partialorder %v990_v11, 0.0  ;;  %v1118_v25 = vmul.f32 0.2, %v990_v11  ;;  %v1822_v31 = vpop.f32.mrf.mxu0  ;;  %v1854_v32 = vpop.f32.mrf.mxu1 }
  0xf3   :  { %vm1086_vm4 = vcmp.gt.f32.partialorder %v1022_v12, 0.0  ;;  %v1150_v28 = vmul.f32 0.2, %v1022_v12  ;;  %861 = vst.msk [vmem:[#allocation2 + $0x70] sm:$0xff] %vm19_vm0, %v796_v13  ;;  %893 = vst.msk [vmem:[#allocation2 + $0x170] sm:$0xff] %vm19_vm0, %v828_v14  ;;  %v795_v26 = vadd.f32 %v578_v58, %v97_v1  ;;  %v827_v27 = vadd.f32 %v706_v59, %v129_v61 }
  0xf4   :  { %859 = vst.msk [vmem:[#allocation2 + $0x60] sm:$0xff] %vm19_vm0, %v794_v7  ;;  %891 = vst.msk [vmem:[#allocation2 + $0x160] sm:$0xff] %vm19_vm0, %v826_v17  ;;  %v800_v29 = vadd.f32 %v1821_v9, %v102_v15  ;;  %v832_v30 = vadd.f32 %v1853_v10, %v134_v16  ;;  %v1182_v35 = vsel %vm1054_vm3, %v990_v11, %v1118_v25  ;;  %v594_v47 = vpop.f32.mrf.mxu0  ;;  %v722_v48 = vpop.f32.mrf.mxu1 }
  0xf5   :  { %862 = vst.msk [vmem:[#allocation2 + $0x78] sm:$0xff] %vm19_vm0, %v797_v18  ;;  %894 = vst.msk [vmem:[#allocation2 + $0x178] sm:$0xff] %vm19_vm0, %v829_v19  ;;  %v1214_v36 = vsel %vm1086_vm4, %v1022_v12, %v1150_v28  ;;  %v798_v37 = vadd.f32 %v591_v20, %v100_v6  ;;  %v830_v40 = vadd.f32 %v719_v22, %v132_v21  ;;  %v924_v50 = vld [vmem:[#allocation2 + $0x50] sm:$0xff] }
  0xf6   :  { %v1703_v41 = vpack.c.bf16 %v1182_v35, %v1182_v35  ;;  %v1735_v42 = vpack.c.bf16 %v1214_v36, %v1214_v36  ;;  %860 = vst.msk [vmem:[#allocation2 + $0x68] sm:$0xff] %vm19_vm0, %v795_v26  ;;  %892 = vst.msk [vmem:[#allocation2 + $0x168] sm:$0xff] %vm19_vm0, %v827_v27  ;;  %v801_v43 = vadd.f32 %v1822_v31, %v103_v23  ;;  %v956_v51 = vld [vmem:[#allocation2 + $0x150] sm:$0xff]  ;;  %v922_v52 = vld [vmem:[#allocation2 + $0x40] sm:$0xff]  ;;  %v1825_v38 = vpop.f32.mrf.mxu0  ;;  %v2372_v39 = vpop.f32.mrf.mxu1 }
  0xf7   :  { %865 = vst.msk [vmem:[#allocation2 + $0x90] sm:$0xff] %vm19_vm0, %v800_v29  ;;  %897 = vst.msk [vmem:[#allocation2 + $0x190] sm:$0xff] %vm19_vm0, %v832_v30  ;;  %v833_v44 = vadd.f32 %v1854_v32, %v135_v24  ;;  %v799_v53 = vadd.f32 %v594_v47, %v101_v33  ;;  %v831_v54 = vadd.f32 %v722_v48, %v133_v34  ;;  %v954_v58 = vld [vmem:[#allocation2 + $0x140] sm:$0xff]  ;;  %v925_v59 = vld [vmem:[#allocation2 + $0x58] sm:$0xff] }
  0xf8   :  { %863 = vst.msk [vmem:[#allocation2 + $0x80] sm:$0xff] %vm19_vm0, %v798_v37  ;;  %895 = vst.msk [vmem:[#allocation2 + $0x180] sm:$0xff] %vm19_vm0, %v830_v40  ;;  %v995_v55 = vadd.f32 %v2211_v62, %v924_v50  ;;  %v1027_v56 = vadd.f32 %v2211_v62, %v956_v51  ;;  %v993_v57 = vadd.f32 %v2211_v62, %v922_v52  ;;  %v957_v63 = vld [vmem:[#allocation2 + $0x158] sm:$0xff]  ;;  %v2379_v4 = vpop.f32.mrf.mxu0  ;;  %v2381_v5 = vpop.f32.mrf.mxu1 }
  0xf9   :  { %1503 = vst.msk [vmem:[%s2708_s3 + $0x14] sm:$0xf] %vm1497_vm2, %v1703_v41  ;;  %1535 = vst.msk [vmem:[%s2708_s3 + $0x94] sm:$0xf] %vm1497_vm2, %v1735_v42  ;;  %v1025_v45 = vadd.f32 %v2211_v62, %v954_v58  ;;  %v996_v0 = vadd.f32 %v2211_v62, %v925_v59  ;;  %v1028_v46 = vadd.f32 %v2211_v62, %v957_v63  ;;  %v923_v11 = vld [vmem:[#allocation2 + $0x48] sm:$0xff] }
  0xfa   :  { %866 = vst.msk [vmem:[#allocation2 + $0x98] sm:$0xff] %vm19_vm0, %v801_v43  ;;  %898 = vst.msk [vmem:[#allocation2 + $0x198] sm:$0xff] %vm19_vm0, %v833_v44  ;;  %v804_v1 = vadd.f32 %v1825_v38, %v106_v49  ;;  %vm1059_vm5 = vcmp.gt.f32.partialorder %v995_v55, 0.0  ;;  %v1123_v2 = vmul.f32 0.2, %v995_v55  ;;  %vm1091_vm6 = vcmp.gt.f32.partialorder %v1027_v56, 0.0  ;;  %v2384_v14 = vpop.f32.mrf.mxu0  ;;  %v2386_v15 = vpop.f32.mrf.mxu1 }
  0xfb   :  { %864 = vst.msk [vmem:[#allocation2 + $0x88] sm:$0xff] %vm19_vm0, %v799_v53  ;;  %896 = vst.msk [vmem:[#allocation2 + $0x188] sm:$0xff] %vm19_vm0, %v831_v54  ;;  %v1155_v3 = vmul.f32 0.2, %v1027_v56  ;;  %vm1057_vm7 = vcmp.gt.f32.partialorder %v993_v57, 0.0  ;;  %vm1089_vm8 = vcmp.gt.f32.partialorder %v1025_v45, 0.0  ;;  %v994_v27 = vadd.f32 %v2211_v62, %v923_v11 }
  0xfc   :  { %v1121_v8 = vmul.f32 0.2, %v993_v57  ;;  %v1153_v60 = vmul.f32 0.2, %v1025_v45  ;;  %869 = vst.msk [vmem:[#allocation2 + $0xb0] sm:$0xff] %vm19_vm0, %v804_v1  ;;  %v1187_v61 = vsel %vm1059_vm5, %v995_v55, %v1123_v2  ;;  %vm1060_vm9 = vcmp.gt.f32.partialorder %v996_v0, 0.0  ;;  %v2390_v24 = vpop.f32.mrf.mxu0  ;;  %v2392_v25 = vpop.f32.mrf.mxu1 }
  0xfd   :  { %v1219_v9 = vsel %vm1091_vm6, %v1027_v56, %v1155_v3  ;;  %v1124_v10 = vmul.f32 0.2, %v996_v0  ;;  %v955_v12 = vld [vmem:[#allocation2 + $0x148] sm:$0xff]  ;;  %v928_v13 = vld [vmem:[#allocation2 + $0x70] sm:$0xff]  ;;  %v1708_v16 = vpack.c.bf16 %v1187_v61, %v1187_v61  ;;  %v926_v19 = vld [vmem:[#allocation2 + $0x60] sm:$0xff]  ;;  %vm1092_vm10 = vcmp.gt.f32.partialorder %v1028_v46, 0.0 }
  0xfe   :  { %v1740_v6 = vpack.c.bf16 %v1219_v9, %v1219_v9  ;;  %v1185_v7 = vsel %vm1057_vm7, %v993_v57, %v1121_v8  ;;  %v1217_v17 = vsel %vm1089_vm8, %v1025_v45, %v1153_v60  ;;  %v960_v18 = vld [vmem:[#allocation2 + $0x170] sm:$0xff]  ;;  %v958_v20 = vld [vmem:[#allocation2 + $0x160] sm:$0xff]  ;;  %v1156_v26 = vmul.f32 0.2, %v1028_v46  ;;  %v2416_v34 = vpop.f32.mrf.mxu0  ;;  %v2418_v35 = vpop.f32.mrf.mxu1  ;;  %v929_v49 = vld [vmem:[#allocation2 + $0x78] sm:$0xff] }
  0xff   :  { %v1706_v21 = vpack.c.bf16 %v1185_v7, %v1185_v7  ;;  %v1738_v22 = vpack.c.bf16 %v1217_v17, %v1217_v17  ;;  %v1188_v23 = vsel %vm1060_vm9, %v996_v0, %v1124_v10  ;;  %1508 = vst.msk [vmem:[%s2708_s3 + $0x28] sm:$0xf] %vm1497_vm2, %v1708_v16  ;;  %v1026_v29 = vadd.f32 %v2211_v62, %v955_v12  ;;  %v961_v54 = vld [vmem:[#allocation2 + $0x178] sm:$0xff]  ;;  %v927_v55 = vld [vmem:[#allocation2 + $0x68] sm:$0xff]  ;;  %v932_v63 = vld [vmem:[#allocation2 + $0x90] sm:$0xff] }
 0x100   :  { %1540 = vst.msk [vmem:[%s2708_s3 + $0xa8] sm:$0xf] %vm1497_vm2, %v1740_v6  ;;  %v1709_v28 = vpack.c.bf16 %v1188_v23, %v1188_v23  ;;  %v999_v30 = vadd.f32 %v2211_v62, %v928_v13  ;;  %v1031_v31 = vadd.f32 %v2211_v62, %v960_v18  ;;  %v997_v32 = vadd.f32 %v2211_v62, %v926_v19  ;;  %v2425_v43 = vpop.f32.mrf.mxu0  ;;  %v2427_v44 = vpop.f32.mrf.mxu1  ;;  %v959_v56 = vld [vmem:[#allocation2 + $0x168] sm:$0xff]  ;;  %v964_v16 = vld [vmem:[#allocation2 + $0x190] sm:$0xff]  ;;  %v930_v18 = vld [vmem:[#allocation2 + $0x80] sm:$0xff] }
 0x101   :  { %1506 = vst.msk [vmem:[%s2708_s3 + $0x20] sm:$0xf] %vm1497_vm2, %v1706_v21  ;;  %1538 = vst.msk [vmem:[%s2708_s3 + $0xa0] sm:$0xf] %vm1497_vm2, %v1738_v22  ;;  %v1029_v33 = vadd.f32 %v2211_v62, %v958_v20  ;;  %v1220_v36 = vsel %vm1092_vm10, %v1028_v46, %v1156_v26  ;;  %vm1058_vm11 = vcmp.gt.f32.partialorder %v994_v27, 0.0  ;;  %vm1090_vm12 = vcmp.gt.f32.partialorder %v1026_v29, 0.0 }
 0x102   :  { %1509 = vst.msk [vmem:[%s2708_s3 + $0x2c] sm:$0xf] %vm1497_vm2, %v1709_v28  ;;  %v1122_v37 = vmul.f32 0.2, %v994_v27  ;;  %v1741_v40 = vpack.c.bf16 %v1220_v36, %v1220_v36  ;;  %v1154_v41 = vmul.f32 0.2, %v1026_v29  ;;  %v1000_v46 = vadd.f32 %v2211_v62, %v929_v49  ;;  %v2439_v1 = vpop.f32.mrf.mxu0  ;;  %v2441_v2 = vpop.f32.mrf.mxu1 }
 0x103   :  { %vm1063_vm13 = vcmp.gt.f32.partialorder %v999_v30, 0.0  ;;  %v1127_v42 = vmul.f32 0.2, %v999_v30  ;;  %vm1095_vm14 = vcmp.gt.f32.partialorder %v1031_v31, 0.0  ;;  %v1159_v48 = vmul.f32 0.2, %v1031_v31 }
 0x104   :  { %v1186_v47 = vsel %vm1058_vm11, %v994_v27, %v1122_v37  ;;  %vm1061_vm15 = vcmp.gt.f32.partialorder %v997_v32, 0.0  ;;  %1541 = vst.msk [vmem:[%s2708_s3 + $0xac] sm:$0xf] %vm1497_vm2, %v1741_v40  ;;  %v1218_v51 = vsel %vm1090_vm12, %v1026_v29, %v1154_v41  ;;  %v1125_v53 = vmul.f32 0.2, %v997_v32  ;;  %v2464_v19 = vpop.f32.mrf.mxu0  ;;  %v2466_v20 = vpop.f32.mrf.mxu1  ;;  %v962_v28 = vld [vmem:[#allocation2 + $0x180] sm:$0xff] }
 0x105   :  { %v1707_v50 = vpack.c.bf16 %v1186_v47, %v1186_v47  ;;  %v1191_v52 = vsel %vm1063_vm13, %v999_v30, %v1127_v42  ;;  %v1739_v57 = vpack.c.bf16 %v1218_v51, %v1218_v51  ;;  %v1223_v59 = vsel %vm1095_vm14, %v1031_v31, %v1159_v48  ;;  %v933_v31 = vld [vmem:[#allocation2 + $0x98] sm:$0xff]  ;;  %v931_v41 = vld [vmem:[#allocation2 + $0x88] sm:$0xff] }
 0x106   :  { %v1712_v58 = vpack.c.bf16 %v1191_v52, %v1191_v52  ;;  %vm1093_vm1 = vcmp.gt.f32.partialorder %v1029_v33, 0.0  ;;  %v1744_v38 = vpack.c.bf16 %v1223_v59, %v1223_v59  ;;  %v1189_v45 = vsel %vm1061_vm15, %v997_v32, %v1125_v53  ;;  %v965_v32 = vld [vmem:[#allocation2 + $0x198] sm:$0xff]  ;;  %v2484_v49 = vpop.f32.mrf.mxu0 }
 0x107   :  { %1507 = vst.msk [vmem:[%s2708_s3 + $0x24] sm:$0xf] %vm1497_vm2, %v1707_v50  ;;  %v1157_v0 = vmul.f32 0.2, %v1029_v33  ;;  %1539 = vst.msk [vmem:[%s2708_s3 + $0xa4] sm:$0xf] %vm1497_vm2, %v1739_v57  ;;  %v1710_v3 = vpack.c.bf16 %v1189_v45, %v1189_v45  ;;  %v1032_v8 = vadd.f32 %v2211_v62, %v961_v54  ;;  %v998_v60 = vadd.f32 %v2211_v62, %v927_v55  ;;  %v2486_v50 = vpop.f32.mrf.mxu1 }
 0x108   :  { %1512 = vst.msk [vmem:[%s2708_s3 + $0x38] sm:$0xf] %vm1497_vm2, %v1712_v58  ;;  %v1030_v61 = vadd.f32 %v2211_v62, %v959_v56  ;;  %1544 = vst.msk [vmem:[%s2708_s3 + $0xb8] sm:$0xf] %vm1497_vm2, %v1744_v38  ;;  %vm1064_vm3 = vcmp.gt.f32.partialorder %v1000_v46, 0.0  ;;  %v1003_v11 = vadd.f32 %v2211_v62, %v932_v63  ;;  %v1035_v30 = vadd.f32 %v2211_v62, %v964_v16  ;;  %v963_v63 = vld [vmem:[#allocation2 + $0x188] sm:$0xff] }
 0x109   :  { %v1221_v9 = vsel %vm1093_vm1, %v1029_v33, %v1157_v0  ;;  %v1128_v10 = vmul.f32 0.2, %v1000_v46  ;;  %1510 = vst.msk [vmem:[%s2708_s3 + $0x30] sm:$0xf] %vm1497_vm2, %v1710_v3  ;;  %vm1096_vm4 = vcmp.gt.f32.partialorder %v1032_v8, 0.0  ;;  %vm1062_vm5 = vcmp.gt.f32.partialorder %v998_v60, 0.0 }
 0x10a   :  { %v1742_v12 = vpack.c.bf16 %v1221_v9, %v1221_v9  ;;  %v1160_v13 = vmul.f32 0.2, %v1032_v8  ;;  %v1126_v7 = vmul.f32 0.2, %v998_v60  ;;  %vm1094_vm6 = vcmp.gt.f32.partialorder %v1030_v61, 0.0  ;;  %v936_v38 = vld [vmem:[#allocation2 + $0xb0] sm:$0xff] }
 0x10b   :  { %v1192_v6 = vsel %vm1064_vm3, %v1000_v46, %v1128_v10  ;;  %v1158_v17 = vmul.f32 0.2, %v1030_v61  ;;  %vm1067_vm7 = vcmp.gt.f32.partialorder %v1003_v11, 0.0  ;;  %v1131_v23 = vmul.f32 0.2, %v1003_v11  ;;  %v138_v3 = vld [vmem:[#allocation2 + $0x1b0] sm:$0xff] }
 0x10c   :  { %1542 = vst.msk [vmem:[%s2708_s3 + $0xb0] sm:$0xf] %vm1497_vm2, %v1742_v12  ;;  %v1713_v21 = vpack.c.bf16 %v1192_v6, %v1192_v6  ;;  %v1224_v22 = vsel %vm1096_vm4, %v1032_v8, %v1160_v13  ;;  %v1190_v27 = vsel %vm1062_vm5, %v998_v60, %v1126_v7  ;;  %v1001_v40 = vadd.f32 %v2211_v62, %v930_v18  ;;  %v104_v8 = vld [vmem:[#allocation2 + $0xa0] sm:$0xff]  ;;  %v2503_v60 = vpop.f32.mrf.mxu0  ;;  %v107_v13 = vld [vmem:[#allocation2 + $0xb8] sm:$0xff] }
 0x10d   :  { %v1745_v26 = vpack.c.bf16 %v1224_v22, %v1224_v22  ;;  %v1222_v29 = vsel %vm1094_vm6, %v1030_v61, %v1158_v17  ;;  %v1711_v33 = vpack.c.bf16 %v1190_v27, %v1190_v27  ;;  %v1195_v37 = vsel %vm1067_vm7, %v1003_v11, %v1131_v23  ;;  %v2505_v61 = vpop.f32.mrf.mxu1  ;;  %v136_v12 = vld [vmem:[#allocation2 + $0x1a0] sm:$0xff]  ;;  %v139_v18 = vld [vmem:[#allocation2 + $0x1b8] sm:$0xff]  ;;  %v137_v22 = vld [vmem:[#allocation2 + $0x1a8] sm:$0xff] }
 0x10e   :  { %1513 = vst.msk [vmem:[%s2708_s3 + $0x3c] sm:$0xf] %vm1497_vm2, %v1713_v21  ;;  %v1743_v36 = vpack.c.bf16 %v1222_v29, %v1222_v29  ;;  %v1716_v42 = vpack.c.bf16 %v1195_v37, %v1195_v37  ;;  %vm1099_vm8 = vcmp.gt.f32.partialorder %v1035_v30, 0.0  ;;  %v1163_v47 = vmul.f32 0.2, %v1035_v30  ;;  %v105_v21 = vld [vmem:[#allocation2 + $0xa8] sm:$0xff]  ;;  %v1834_v37 = vpop.f32.mrf.mxu0 }
 0x10f   :  { %1545 = vst.msk [vmem:[%s2708_s3 + $0xbc] sm:$0xf] %vm1497_vm2, %v1745_v26  ;;  %v1033_v48 = vadd.f32 %v2211_v62, %v962_v28  ;;  %1511 = vst.msk [vmem:[%s2708_s3 + $0x34] sm:$0xf] %vm1497_vm2, %v1711_v33  ;;  %vm1065_vm9 = vcmp.gt.f32.partialorder %v1001_v40, 0.0  ;;  %v1004_v52 = vadd.f32 %v2211_v62, %v933_v31  ;;  %v1036_v53 = vadd.f32 %v2211_v62, %v965_v32  ;;  %v110_v29 = vld [vmem:[#allocation2 + $0xd0] sm:$0xff] }
 0x110   :  { %1543 = vst.msk [vmem:[%s2708_s3 + $0xb4] sm:$0xf] %vm1497_vm2, %v1743_v36  ;;  %v1129_v51 = vmul.f32 0.2, %v1001_v40  ;;  %1516 = vst.msk [vmem:[%s2708_s3 + $0x48] sm:$0xf] %vm1497_vm2, %v1716_v42  ;;  %v1227_v54 = vsel %vm1099_vm8, %v1035_v30, %v1163_v47  ;;  %v1002_v56 = vadd.f32 %v2211_v62, %v931_v41  ;;  %v1034_v7 = vadd.f32 %v2211_v62, %v963_v63 }
 0x111   :  { %vm1097_vm10 = vcmp.gt.f32.partialorder %v1033_v48, 0.0  ;;  %v1161_v55 = vmul.f32 0.2, %v1033_v48  ;;  %v1748_v57 = vpack.c.bf16 %v1227_v54, %v1227_v54  ;;  %vm1068_vm11 = vcmp.gt.f32.partialorder %v1004_v52, 0.0  ;;  %v142_v30 = vld [vmem:[#allocation2 + $0x1d0] sm:$0xff]  ;;  %v108_v31 = vld [vmem:[#allocation2 + $0xc0] sm:$0xff] }
 0x112   :  { %v1193_v58 = vsel %vm1065_vm9, %v1001_v40, %v1129_v51  ;;  %v1132_v59 = vmul.f32 0.2, %v1004_v52  ;;  %vm1100_vm12 = vcmp.gt.f32.partialorder %v1036_v53, 0.0  ;;  %v1164_v46 = vmul.f32 0.2, %v1036_v53  ;;  %v140_v33 = vld [vmem:[#allocation2 + $0x1c0] sm:$0xff]  ;;  %v1866_v40 = vpop.f32.mrf.mxu1 }
 0x113   :  { %v1714_v45 = vpack.c.bf16 %v1193_v58, %v1193_v58  ;;  %v1225_v0 = vsel %vm1097_vm10, %v1033_v48, %v1161_v55  ;;  %1548 = vst.msk [vmem:[%s2708_s3 + $0xc8] sm:$0xf] %vm1497_vm2, %v1748_v57  ;;  %vm1066_vm13 = vcmp.gt.f32.partialorder %v1002_v56, 0.0  ;;  %v1130_v11 = vmul.f32 0.2, %v1002_v56  ;;  %v111_v36 = vld [vmem:[#allocation2 + $0xd8] sm:$0xff] }
 0x114   :  { %v1746_v9 = vpack.c.bf16 %v1225_v0, %v1225_v0  ;;  %v1196_v10 = vsel %vm1068_vm11, %v1004_v52, %v1132_v59  ;;  %v1228_v6 = vsel %vm1100_vm12, %v1036_v53, %v1164_v46  ;;  %v1007_v17 = vadd.f32 %v2211_v62, %v936_v38  ;;  %v143_v47 = vld [vmem:[#allocation2 + $0x1d8] sm:$0xff]  ;;  %v109_v48 = vld [vmem:[#allocation2 + $0xc8] sm:$0xff]  ;;  %v114_v55 = vld [vmem:[#allocation2 + $0xf0] sm:$0xff] }
 0x115   :  { %1514 = vst.msk [vmem:[%s2708_s3 + $0x40] sm:$0xf] %vm1497_vm2, %v1714_v45  ;;  %v1717_v16 = vpack.c.bf16 %v1196_v10, %v1196_v10  ;;  %v1749_v23 = vpack.c.bf16 %v1228_v6, %v1228_v6  ;;  %v1194_v28 = vsel %vm1066_vm13, %v1002_v56, %v1130_v11  ;;  %v836_v26 = vadd.f32 %v2372_v39, %v138_v3  ;;  %v141_v51 = vld [vmem:[#allocation2 + $0x1c8] sm:$0xff]  ;;  %v112_v56 = vld [vmem:[#allocation2 + $0xe0] sm:$0xff]  ;;  %v147_v63 = vld [vmem:[#allocation2 + $0x1f8] sm:$0xff] }
 0x116   :  { %1546 = vst.msk [vmem:[%s2708_s3 + $0xc0] sm:$0xf] %vm1497_vm2, %v1746_v9  ;;  %v802_v27 = vadd.f32 %v2379_v4, %v104_v8  ;;  %v1715_v62 = vpack.c.bf16 %v1194_v28, %v1194_v28  ;;  %vm1098_vm14 = vcmp.gt.f32.partialorder %v1034_v7, 0.0  ;;  %v1162_v32 = vmul.f32 0.2, %v1034_v7  ;;  %v144_v59 = vld [vmem:[#allocation2 + $0x1e0] sm:$0xff] }
 0x117   :  { %1517 = vst.msk [vmem:[%s2708_s3 + $0x4c] sm:$0xf] %vm1497_vm2, %v1717_v16  ;;  %vm1071_vm15 = vcmp.gt.f32.partialorder %v1007_v17, 0.0  ;;  %1549 = vst.msk [vmem:[%s2708_s3 + $0xcc] sm:$0xf] %vm1497_vm2, %v1749_v23  ;;  %v834_v4 = vadd.f32 %v2381_v5, %v136_v12  ;;  %v805_v41 = vadd.f32 %v2384_v14, %v107_v13  ;;  %v837_v42 = vadd.f32 %v2386_v15, %v139_v18  ;;  %v146_v14 = vld [vmem:[#allocation2 + $0x1f0] sm:$0xff] }
 0x118   :  { %v1135_v39 = vmul.f32 0.2, %v1007_v17  ;;  %901 = vst.msk [vmem:[#allocation2 + $0x1b0] sm:$0xff] %vm19_vm0, %v836_v26  ;;  %867 = vst.msk [vmem:[#allocation2 + $0xa0] sm:$0xff] %vm19_vm0, %v802_v27  ;;  %v1226_v52 = vsel %vm1098_vm14, %v1034_v7, %v1162_v32  ;;  %v803_v53 = vadd.f32 %v2390_v24, %v105_v21  ;;  %v835_v54 = vadd.f32 %v2392_v25, %v137_v22  ;;  %v115_v25 = vld [vmem:[#allocation2 + $0xf8] sm:$0xff]  ;;  %v113_v46 = vld [vmem:[#allocation2 + $0xe8] sm:$0xff] }
 0x119   :  { %1515 = vst.msk [vmem:[%s2708_s3 + $0x44] sm:$0xf] %vm1497_vm2, %v1715_v62  ;;  %v808_v5 = vadd.f32 %v2416_v34, %v110_v29  ;;  %v1747_v15 = vpack.c.bf16 %v1226_v52, %v1226_v52  ;;  %v840_v58 = vadd.f32 %v2418_v35, %v142_v30  ;;  %v806_v24 = vadd.f32 %v2425_v43, %v108_v31  ;;  %v642_v35 = vpop.f32.mrf.mxu0  ;;  %v145_v3 = vld [vmem:[#allocation2 + $0x1e8] sm:$0xff]  ;;  %v770_v43 = vpop.f32.mrf.mxu1 }
 0x11a   :  { %v1199_v57 = vsel %vm1071_vm15, %v1007_v17, %v1135_v39  ;;  %899 = vst.msk [vmem:[#allocation2 + $0x1a0] sm:$0xff] %vm19_vm0, %v834_v4  ;;  %870 = vst.msk [vmem:[#allocation2 + $0xb8] sm:$0xff] %vm19_vm0, %v805_v41  ;;  %v838_v38 = vadd.f32 %v2427_v44, %v140_v33  ;;  %v809_v45 = vadd.f32 %v2439_v1, %v111_v36 }
 0x11b   :  { %902 = vst.msk [vmem:[#allocation2 + $0x1b8] sm:$0xff] %vm19_vm0, %v837_v42  ;;  %v1720_v34 = vpack.c.bf16 %v1199_v57, %v1199_v57  ;;  %868 = vst.msk [vmem:[#allocation2 + $0xa8] sm:$0xff] %vm19_vm0, %v803_v53  ;;  %v841_v0 = vadd.f32 %v2441_v2, %v143_v47  ;;  %v807_v8 = vadd.f32 %v2464_v19, %v109_v48 }
 0x11c   :  { %900 = vst.msk [vmem:[#allocation2 + $0x1a8] sm:$0xff] %vm19_vm0, %v835_v54  ;;  %873 = vst.msk [vmem:[#allocation2 + $0xd0] sm:$0xff] %vm19_vm0, %v808_v5  ;;  %v839_v44 = vadd.f32 %v2466_v20, %v141_v51  ;;  %v812_v1 = vadd.f32 %v2484_v49, %v114_v55  ;;  %v844_v2 = vadd.f32 %v2486_v50, %v146_v14 }
 0x11d   :  { %1547 = vst.msk [vmem:[%s2708_s3 + $0xc4] sm:$0xf] %vm1497_vm2, %v1747_v15  ;;  %1520 = vst.msk [vmem:[%s2708_s3 + $0x58] sm:$0xf] %vm1497_vm2, %v1720_v34  ;;  %v810_v9 = vadd.f32 %v2503_v60, %v112_v56  ;;  %v842_v19 = vadd.f32 %v2505_v61, %v144_v59  ;;  %v813_v20 = vadd.f32 %v1834_v37, %v115_v25  ;;  %v2586_v60 = vld [vmem:[%s2707_s2] ss:$0 sm:$0xff] }
 0x11e   :  { %905 = vst.msk [vmem:[#allocation2 + $0x1d0] sm:$0xff] %vm19_vm0, %v840_v58  ;;  %871 = vst.msk [vmem:[#allocation2 + $0xc0] sm:$0xff] %vm19_vm0, %v806_v24  ;;  %v845_v10 = vadd.f32 %v1866_v40, %v147_v63  ;;  %v811_v49 = vadd.f32 %v642_v35, %v113_v46  ;;  %v843_v50 = vadd.f32 %v770_v43, %v145_v3 }
 0x11f   :  { %903 = vst.msk [vmem:[#allocation2 + $0x1c0] sm:$0xff] %vm19_vm0, %v838_v38  ;;  %874 = vst.msk [vmem:[#allocation2 + $0xd8] sm:$0xff] %vm19_vm0, %v809_v45  ;;  %v968_v11 = vld [vmem:[#allocation2 + $0x1b0] sm:$0xff]  ;;  %v934_v12 = vld [vmem:[#allocation2 + $0xa0] sm:$0xff] }
 0x120   :  { %906 = vst.msk [vmem:[#allocation2 + $0x1d8] sm:$0xff] %vm19_vm0, %v841_v0  ;;  %872 = vst.msk [vmem:[#allocation2 + $0xc8] sm:$0xff] %vm19_vm0, %v807_v8  ;;  %v1039_v61 = vadd.f32 %v2586_v60, %v968_v11  ;;  %v1005_v13 = vadd.f32 %v2586_v60, %v934_v12 }
 0x121   :  { %904 = vst.msk [vmem:[#allocation2 + $0x1c8] sm:$0xff] %vm19_vm0, %v839_v44  ;;  %877 = vst.msk [vmem:[#allocation2 + $0xf0] sm:$0xff] %vm19_vm0, %v812_v1  ;;  %v966_v16 = vld [vmem:[#allocation2 + $0x1a0] sm:$0xff]  ;;  %v937_v6 = vld [vmem:[#allocation2 + $0xb8] sm:$0xff] }
 0x122   :  { %909 = vst.msk [vmem:[#allocation2 + $0x1f0] sm:$0xff] %vm19_vm0, %v844_v2  ;;  %875 = vst.msk [vmem:[#allocation2 + $0xe0] sm:$0xff] %vm19_vm0, %v810_v9  ;;  %v969_v7 = vld [vmem:[#allocation2 + $0x1b8] sm:$0xff]  ;;  %vm1103_vm1 = vcmp.gt.f32.partialorder %v1039_v61, 0.0  ;;  %v1167_v17 = vmul.f32 0.2, %v1039_v61  ;;  %v1037_v21 = vadd.f32 %v2586_v60, %v966_v16  ;;  %v1008_v22 = vadd.f32 %v2586_v60, %v937_v6 }
 0x123   :  { %907 = vst.msk [vmem:[#allocation2 + $0x1e0] sm:$0xff] %vm19_vm0, %v842_v19  ;;  %878 = vst.msk [vmem:[#allocation2 + $0xf8] sm:$0xff] %vm19_vm0, %v813_v20  ;;  %vm1069_vm3 = vcmp.gt.f32.partialorder %v1005_v13, 0.0  ;;  %v1133_v18 = vmul.f32 0.2, %v1005_v13  ;;  %v1040_v23 = vadd.f32 %v2586_v60, %v969_v7  ;;  %v935_v28 = vld [vmem:[#allocation2 + $0xa8] sm:$0xff] }
 0x124   :  { %910 = vst.msk [vmem:[#allocation2 + $0x1f8] sm:$0xff] %vm19_vm0, %v845_v10  ;;  %876 = vst.msk [vmem:[#allocation2 + $0xe8] sm:$0xff] %vm19_vm0, %v811_v49  ;;  %v967_v26 = vld [vmem:[#allocation2 + $0x1a8] sm:$0xff]  ;;  %v1231_v27 = vsel %vm1103_vm1, %v1039_v61, %v1167_v17  ;;  %v1006_v30 = vadd.f32 %v2586_v60, %v935_v28  ;;  %v1165_v33 = vmul.f32 0.2, %v1037_v21  ;;  %v940_v36 = vld [vmem:[#allocation2 + $0xd0] sm:$0xff] }
 0x125   :  { %908 = vst.msk [vmem:[#allocation2 + $0x1e8] sm:$0xff] %vm19_vm0, %v843_v50  ;;  %v1197_v29 = vsel %vm1069_vm3, %v1005_v13, %v1133_v18  ;;  %v1038_v31 = vadd.f32 %v2586_v60, %v967_v26  ;;  %v1752_v62 = vpack.c.bf16 %v1231_v27, %v1231_v27  ;;  %vm1101_vm0 = vcmp.gt.f32.partialorder %v1037_v21, 0.0  ;;  %v972_v41 = vld [vmem:[#allocation2 + $0x1d0] sm:$0xff]  ;;  %v938_v42 = vld [vmem:[#allocation2 + $0xc0] sm:$0xff] }
 0x126   :  { %v1718_v32 = vpack.c.bf16 %v1197_v29, %v1197_v29  ;;  %vm1072_vm4 = vcmp.gt.f32.partialorder %v1008_v22, 0.0  ;;  %v1136_v37 = vmul.f32 0.2, %v1008_v22  ;;  %vm1104_vm5 = vcmp.gt.f32.partialorder %v1040_v23, 0.0  ;;  %v970_v53 = vld [vmem:[#allocation2 + $0x1c0] sm:$0xff]  ;;  %v941_v24 = vld [vmem:[#allocation2 + $0xd8] sm:$0xff] }
 0x127   :  { %v1168_v40 = vmul.f32 0.2, %v1040_v23  ;;  %1552 = vst.msk [vmem:[%s2708_s3 + $0xd8] sm:$0xf] %vm1497_vm2, %v1752_v62  ;;  %v1229_v39 = vsel %vm1101_vm0, %v1037_v21, %v1165_v33  ;;  %vm1070_vm6 = vcmp.gt.f32.partialorder %v1006_v30, 0.0  ;;  %vm1102_vm7 = vcmp.gt.f32.partialorder %v1038_v31, 0.0 }
 0x128   :  { %1518 = vst.msk [vmem:[%s2708_s3 + $0x50] sm:$0xf] %vm1497_vm2, %v1718_v32  ;;  %v1134_v4 = vmul.f32 0.2, %v1006_v30  ;;  %v1750_v47 = vpack.c.bf16 %v1229_v39, %v1229_v39  ;;  %v1200_v48 = vsel %vm1072_vm4, %v1008_v22, %v1136_v37  ;;  %v1166_v52 = vmul.f32 0.2, %v1038_v31 }
 0x129   :  { %v1232_v51 = vsel %vm1104_vm5, %v1040_v23, %v1168_v40  ;;  %v1721_v54 = vpack.c.bf16 %v1200_v48, %v1200_v48  ;;  %v1011_v14 = vadd.f32 %v2586_v60, %v940_v36  ;;  %v1043_v57 = vadd.f32 %v2586_v60, %v972_v41  ;;  %v973_v34 = vld [vmem:[#allocation2 + $0x1d8] sm:$0xff]  ;;  %v939_v3 = vld [vmem:[#allocation2 + $0xc8] sm:$0xff]  ;;  %v944_v9 = vld [vmem:[#allocation2 + $0xf0] sm:$0xff] }
 0x12a   :  { %v1753_v5 = vpack.c.bf16 %v1232_v51, %v1232_v51  ;;  %v1198_v55 = vsel %vm1070_vm6, %v1006_v30, %v1134_v4  ;;  %1550 = vst.msk [vmem:[%s2708_s3 + $0xd0] sm:$0xf] %vm1497_vm2, %v1750_v47  ;;  %v1230_v15 = vsel %vm1102_vm7, %v1038_v31, %v1166_v52  ;;  %v1009_v58 = vadd.f32 %v2586_v60, %v938_v42  ;;  %v971_v2 = vld [vmem:[#allocation2 + $0x1c8] sm:$0xff]  ;;  %v976_v19 = vld [vmem:[#allocation2 + $0x1f0] sm:$0xff]  ;;  %v942_v50 = vld [vmem:[#allocation2 + $0xe0] sm:$0xff] }
 0x12b   :  { %v1719_v56 = vpack.c.bf16 %v1198_v55, %v1198_v55  ;;  %1521 = vst.msk [vmem:[%s2708_s3 + $0x5c] sm:$0xf] %vm1497_vm2, %v1721_v54  ;;  %v1751_v59 = vpack.c.bf16 %v1230_v15, %v1230_v15  ;;  %vm1075_vm8 = vcmp.gt.f32.partialorder %v1011_v14, 0.0  ;;  %v1139_v25 = vmul.f32 0.2, %v1011_v14  ;;  %v974_v11 = vld [vmem:[#allocation2 + $0x1e0] sm:$0xff] }
 0x12c   :  { %1553 = vst.msk [vmem:[%s2708_s3 + $0xdc] sm:$0xf] %vm1497_vm2, %v1753_v5  ;;  %v1041_v63 = vadd.f32 %v2586_v60, %v970_v53  ;;  %vm1107_vm9 = vcmp.gt.f32.partialorder %v1043_v57, 0.0  ;;  %v1171_v38 = vmul.f32 0.2, %v1043_v57  ;;  %vm1073_vm10 = vcmp.gt.f32.partialorder %v1009_v58, 0.0 }
 0x12d   :  { %1519 = vst.msk [vmem:[%s2708_s3 + $0x54] sm:$0xf] %vm1497_vm2, %v1719_v56  ;;  %v1137_v45 = vmul.f32 0.2, %v1009_v58  ;;  %1551 = vst.msk [vmem:[%s2708_s3 + $0xd4] sm:$0xf] %vm1497_vm2, %v1751_v59  ;;  %v1203_v0 = vsel %vm1075_vm8, %v1011_v14, %v1139_v25  ;;  %v1012_v35 = vadd.f32 %v2586_v60, %v941_v24  ;;  %v1044_v1 = vadd.f32 %v2586_v60, %v973_v34 }
 0x12e   :  { %vm1105_vm11 = vcmp.gt.f32.partialorder %v1041_v63, 0.0  ;;  %v1169_v46 = vmul.f32 0.2, %v1041_v63  ;;  %v1724_v43 = vpack.c.bf16 %v1203_v0, %v1203_v0  ;;  %v1235_v8 = vsel %vm1107_vm9, %v1043_v57, %v1171_v38  ;;  %v945_v32 = vld [vmem:[#allocation2 + $0xf8] sm:$0xff]  ;;  %v943_v4 = vld [vmem:[#allocation2 + $0xe8] sm:$0xff] }
 0x12f   :  { %v1201_v44 = vsel %vm1073_vm10, %v1009_v58, %v1137_v45  ;;  %v1756_v20 = vpack.c.bf16 %v1235_v8, %v1235_v8  ;;  %vm1076_vm12 = vcmp.gt.f32.partialorder %v1012_v35, 0.0  ;;  %v1140_v61 = vmul.f32 0.2, %v1012_v35  ;;  %v977_v39 = vld [vmem:[#allocation2 + $0x1f8] sm:$0xff]  ;;  %v975_v41 = vld [vmem:[#allocation2 + $0x1e8] sm:$0xff] }
 0x130   :  { %v1722_v10 = vpack.c.bf16 %v1201_v44, %v1201_v44  ;;  %v1233_v49 = vsel %vm1105_vm11, %v1041_v63, %v1169_v46  ;;  %1524 = vst.msk [vmem:[%s2708_s3 + $0x68] sm:$0xf] %vm1497_vm2, %v1724_v43  ;;  %vm1108_vm13 = vcmp.gt.f32.partialorder %v1044_v1, 0.0  ;;  %v1172_v13 = vmul.f32 0.2, %v1044_v1 }
 0x131   :  { %v1754_v12 = vpack.c.bf16 %v1233_v49, %v1233_v49  ;;  %1556 = vst.msk [vmem:[%s2708_s3 + $0xe8] sm:$0xf] %vm1497_vm2, %v1756_v20  ;;  %v1010_v16 = vadd.f32 %v2586_v60, %v939_v3  ;;  %v1042_v6 = vadd.f32 %v2586_v60, %v971_v2  ;;  %v1015_v7 = vadd.f32 %v2586_v60, %v944_v9 }
 0x132   :  { %1522 = vst.msk [vmem:[%s2708_s3 + $0x60] sm:$0xf] %vm1497_vm2, %v1722_v10  ;;  %v1047_v17 = vadd.f32 %v2586_v60, %v976_v19  ;;  %v1204_v18 = vsel %vm1076_vm12, %v1012_v35, %v1140_v61  ;;  %v1236_v21 = vsel %vm1108_vm13, %v1044_v1, %v1172_v13  ;;  %v1013_v22 = vadd.f32 %v2586_v60, %v942_v50 }
 0x133   :  { %1554 = vst.msk [vmem:[%s2708_s3 + $0xe0] sm:$0xf] %vm1497_vm2, %v1754_v12  ;;  %v1045_v23 = vadd.f32 %v2586_v60, %v974_v11  ;;  %v1725_v28 = vpack.c.bf16 %v1204_v18, %v1204_v18  ;;  %v1757_v26 = vpack.c.bf16 %v1236_v21, %v1236_v21  ;;  %vm1074_vm14 = vcmp.gt.f32.partialorder %v1010_v16, 0.0 }
 0x134   :  { %v1138_v27 = vmul.f32 0.2, %v1010_v16  ;;  %vm1106_vm15 = vcmp.gt.f32.partialorder %v1042_v6, 0.0  ;;  %v1170_v29 = vmul.f32 0.2, %v1042_v6  ;;  %vm1079_vm1 = vcmp.gt.f32.partialorder %v1015_v7, 0.0 }
 0x135   :  { %v1143_v30 = vmul.f32 0.2, %v1015_v7  ;;  %1525 = vst.msk [vmem:[%s2708_s3 + $0x6c] sm:$0xf] %vm1497_vm2, %v1725_v28  ;;  %1557 = vst.msk [vmem:[%s2708_s3 + $0xec] sm:$0xf] %vm1497_vm2, %v1757_v26  ;;  %v1016_v54 = vadd.f32 %v2586_v60, %v945_v32  ;;  %v1048_v55 = vadd.f32 %v2586_v60, %v977_v39  ;;  %v1014_v14 = vadd.f32 %v2586_v60, %v943_v4 }
 0x136   :  { %v1202_v31 = vsel %vm1074_vm14, %v1010_v16, %v1138_v27  ;;  %vm1111_vm3 = vcmp.gt.f32.partialorder %v1047_v17, 0.0  ;;  %v1175_v62 = vmul.f32 0.2, %v1047_v17  ;;  %vm1077_vm0 = vcmp.gt.f32.partialorder %v1013_v22, 0.0 }
 0x137   :  { %v1723_v33 = vpack.c.bf16 %v1202_v31, %v1202_v31  ;;  %v1234_v36 = vsel %vm1106_vm15, %v1042_v6, %v1170_v29  ;;  %v1207_v37 = vsel %vm1079_vm1, %v1015_v7, %v1143_v30  ;;  %v1141_v40 = vmul.f32 0.2, %v1013_v22 }
 0x138   :  { %v1755_v42 = vpack.c.bf16 %v1234_v36, %v1234_v36  ;;  %v1728_v47 = vpack.c.bf16 %v1207_v37, %v1207_v37  ;;  %v1239_v48 = vsel %vm1111_vm3, %v1047_v17, %v1175_v62  ;;  %vm1109_vm4 = vcmp.gt.f32.partialorder %v1045_v23, 0.0 }
 0x139   :  { %1523 = vst.msk [vmem:[%s2708_s3 + $0x64] sm:$0xf] %vm1497_vm2, %v1723_v33  ;;  %v1760_v51 = vpack.c.bf16 %v1239_v48, %v1239_v48  ;;  %v1205_v52 = vsel %vm1077_vm0, %v1013_v22, %v1141_v40  ;;  %v1173_v53 = vmul.f32 0.2, %v1045_v23  ;;  %v1046_v56 = vadd.f32 %v2586_v60, %v975_v41 }
 0x13a   :  { %1555 = vst.msk [vmem:[%s2708_s3 + $0xe4] sm:$0xf] %vm1497_vm2, %v1755_v42  ;;  %1528 = vst.msk [vmem:[%s2708_s3 + $0x78] sm:$0xf] %vm1497_vm2, %v1728_v47  ;;  %v1726_v5 = vpack.c.bf16 %v1205_v52, %v1205_v52  ;;  %vm1080_vm5 = vcmp.gt.f32.partialorder %v1016_v54, 0.0  ;;  %vm1112_vm6 = vcmp.gt.f32.partialorder %v1048_v55, 0.0 }
 0x13b   :  { %1560 = vst.msk [vmem:[%s2708_s3 + $0xf8] sm:$0xf] %vm1497_vm2, %v1760_v51  ;;  %v1237_v15 = vsel %vm1109_vm4, %v1045_v23, %v1173_v53  ;;  %v1144_v57 = vmul.f32 0.2, %v1016_v54  ;;  %v1176_v24 = vmul.f32 0.2, %v1048_v55 }
 0x13c   :  { %1526 = vst.msk [vmem:[%s2708_s3 + $0x70] sm:$0xf] %vm1497_vm2, %v1726_v5  ;;  %v1758_v58 = vpack.c.bf16 %v1237_v15, %v1237_v15  ;;  %vm1078_vm7 = vcmp.gt.f32.partialorder %v1014_v14, 0.0  ;;  %v1142_v25 = vmul.f32 0.2, %v1014_v14  ;;  %vm1110_vm8 = vcmp.gt.f32.partialorder %v1046_v56, 0.0 }
 0x13d   :  { %v1208_v59 = vsel %vm1080_vm5, %v1016_v54, %v1144_v57  ;;  %v1174_v60 = vmul.f32 0.2, %v1046_v56  ;;  %v1240_v34 = vsel %vm1112_vm6, %v1048_v55, %v1176_v24 }
 0x13e   :  { %1558 = vst.msk [vmem:[%s2708_s3 + $0xf0] sm:$0xf] %vm1497_vm2, %v1758_v58  ;;  %v1729_v63 = vpack.c.bf16 %v1208_v59, %v1208_v59  ;;  %v1761_v38 = vpack.c.bf16 %v1240_v34, %v1240_v34  ;;  %v1206_v45 = vsel %vm1078_vm7, %v1014_v14, %v1142_v25 }
 0x13f   :  { %v1238_v0 = vsel %vm1110_vm8, %v1046_v56, %v1174_v60  ;;  %v1727_v46 = vpack.c.bf16 %v1206_v45, %v1206_v45 }
 0x140   :  { %1529 = vst.msk [vmem:[%s2708_s3 + $0x7c] sm:$0xf] %vm1497_vm2, %v1729_v63  ;;  %v1759_v35 = vpack.c.bf16 %v1238_v0, %v1238_v0  ;;  %1561 = vst.msk [vmem:[%s2708_s3 + $0xfc] sm:$0xf] %vm1497_vm2, %v1761_v38 }
 0x141   :  { %1527 = vst.msk [vmem:[%s2708_s3 + $0x74] sm:$0xf] %vm1497_vm2, %v1727_v46 }
 0x142   :  { %1559 = vst.msk [vmem:[%s2708_s3 + $0xf4] sm:$0xf] %vm1497_vm2, %v1759_v35 }

</bundles_post_ra>
